<compile_context>
chip_gen: v7x
topology: tpu7x:2x2x1
jax: 0.10.0
libtpu: 0.0.40
codegen_flags: <defaults>
</compile_context>

<pallas_src>
import functools

import jax
import jax.numpy as jnp
from jax import lax
from jax.experimental import pallas as pl
from jax.experimental.pallas import tpu as pltpu


def _round_up(x, m):
    return (x + m - 1) // m * m


def _lrga_stats_kernel(x_ref, w_ref, b_ref, vtz_ref, cs_ref, *,
                       k_pad, tm, n_rows, mask_tail, compute_dtype):
    """Phase 1: accumulate V^T @ Z and colsum(U), colsum(V) over all N tiles."""
    i = pl.program_id(0)

    @pl.when(i == 0)
    def _init():
        vtz_ref[...] = jnp.zeros_like(vtz_ref)
        cs_ref[...] = jnp.zeros_like(cs_ref)

    # Projection: bf16 MXU matmul with f32 accumulation, then bias + ReLU.
    tmp = jnp.dot(x_ref[...].astype(compute_dtype),
                  w_ref[...].astype(compute_dtype),
                  preferred_element_type=jnp.float32)
    tmp = jnp.maximum(tmp + b_ref[...], 0.0)               # (tm, 4*k_pad) f32

    if mask_tail:
        # Zero out rows past the true N: zero-padded input rows turn into
        # relu(bias) after the affine and would corrupt the reductions.
        row = i * tm + lax.broadcasted_iota(jnp.int32, (tm, 1), 0)
        tmp = jnp.where(row < n_rows, tmp, 0.0)

    v = tmp[:, 1 * k_pad:2 * k_pad]                        # (tm, k_pad)
    z = tmp[:, 2 * k_pad:3 * k_pad]                        # (tm, k_pad)

    # V^T @ Z as a contraction over the row axis (no explicit transpose).
    vtz_ref[...] += lax.dot_general(v, z, (((0,), (0,)), ((), ())),
                                    preferred_element_type=jnp.float32)
    # Column sums of U (first k_pad lanes) and V (next k_pad lanes).
    cs_ref[...] += jnp.sum(tmp[:, 0:2 * k_pad], axis=0, keepdims=True)


def _lrga_emit_kernel(x_ref, w_ref, b_ref, vtz_ref, o_ref, *,
                      k_pad, compute_dtype):
    """Phase 2: out tile = [U @ (D * V^T Z), T], lane-dense (2*k_pad wide)."""
    tmp = jnp.dot(x_ref[...].astype(compute_dtype),
                  w_ref[...].astype(compute_dtype),
                  preferred_element_type=jnp.float32)
    tmp = jnp.maximum(tmp + b_ref[...], 0.0)               # (tm, 4*k_pad) f32

    u = tmp[:, 0:k_pad]
    t = tmp[:, 3 * k_pad:4 * k_pad]
    res = jnp.dot(u, vtz_ref[...], preferred_element_type=jnp.float32)

    # Two 128-aligned (lane-dense) stores into the (tm, 2*k_pad) output block.
    o_ref[:, 0:k_pad] = res
    o_ref[:, k_pad:2 * k_pad] = t


def lowrank_attention(x, w, b, k, *, compute_dtype=jnp.bfloat16,
                      block_rows=None, vmem_limit_bytes=None):
    """LRGA forward. x: (N, d), w: (d, 4k), b: (4k,). Returns (N, 2k) f32."""
    n, d = x.shape
    assert w.shape == (d, 4 * k), w.shape
    assert b.shape == (4 * k,), b.shape

    k_pad = _round_up(k, 128)
    itemsize = jnp.dtype(compute_dtype).itemsize

    # --- Row-tile selection (VMEM-budgeted, MXU 256-aligned). ----------------
    if block_rows is None:
        # Budget against the smallest default scoped-VMEM limit across
        # v5e/v6e/v7x so the double-buffered pipeline fits without raising
        # vmem_limit_bytes.
        budget = 12 * 1024 * 1024
        per_row = (2 * d * itemsize            # double-buffered x tile
                   + 4 * 4 * k_pad             # f32 tmp intermediate
                   + 2 * 4 * 2 * k_pad)        # double-buffered f32 out tile
        tm = budget // per_row
        tm = max(256, min(4096, (tm // 256) * 256))
        tm = min(tm, max(256, _round_up(n, 256)))
    else:
        assert block_rows % 8 == 0, "block_rows must be a multiple of 8"
        tm = block_rows

    n_pad = _round_up(n, tm)
    grid = (n_pad // tm,)
    mask_tail = n_pad != n

    # --- Lane-aligned re-blocking of parameters (U/V/Z/T split at 128s). -----
    pad_cols = k_pad - k
    w_pad = jnp.concatenate(
        [jnp.pad(w[:, j * k:(j + 1) * k], ((0, 0), (0, pad_cols)))
         for j in range(4)], axis=1)                         # (d, 4*k_pad)
    b_pad = jnp.concatenate(
        [jnp.pad(b[j * k:(j + 1) * k], (0, pad_cols)) for j in range(4)]
    ).reshape(1, 4 * k_pad).astype(jnp.float32)              # (1, 4*k_pad)

    x_in = x.astype(compute_dtype)                           # halve x HBM bytes
    if mask_tail:
        x_in = jnp.pad(x_in, ((0, n_pad - n), (0, 0)))
    w_in = w_pad.astype(compute_dtype)

    proj_flops = 2 * n_pad * d * 4 * k_pad
    lowrank_flops = 2 * n_pad * k_pad * k_pad
    param_bytes = w_in.size * itemsize + b_pad.size * 4
    x_bytes = n_pad * d * itemsize

    # --- Phase 1: accumulate V^T Z and column sums of U, V. ------------------
    stats_kernel = functools.partial(
        _lrga_stats_kernel, k_pad=k_pad, tm=tm, n_rows=n,
        mask_tail=mask_tail, compute_dtype=compute_dtype)
    vtz, cs = pl.pallas_call(
        stats_kernel,
        out_shape=(jax.ShapeDtypeStruct((k_pad, k_pad), jnp.float32),
                   jax.ShapeDtypeStruct((1, 2 * k_pad), jnp.float32)),
        grid=grid,
        in_specs=[
            pl.BlockSpec((tm, d), lambda i: (i, 0)),
            pl.BlockSpec((d, 4 * k_pad), lambda i: (0, 0)),
            pl.BlockSpec((1, 4 * k_pad), lambda i: (0, 0)),
        ],
        out_specs=(
            pl.BlockSpec((k_pad, k_pad), lambda i: (0, 0)),
            pl.BlockSpec((1, 2 * k_pad), lambda i: (0, 0)),
        ),
        compiler_params=pltpu.CompilerParams(
            dimension_semantics=("arbitrary",),      # reduction axis
            vmem_limit_bytes=vmem_limit_bytes),
        cost_estimate=pl.CostEstimate(
            flops=proj_flops + lowrank_flops,
            transcendentals=0,
            bytes_accessed=x_bytes + param_bytes
            + 4 * (k_pad * k_pad + 2 * k_pad)),
    )(x_in, w_in, b_pad)

    # --- joint_normalize2, folded into V^T Z (global N, not tile-local). -----
    # nf = sum(U @ (V^T @ ones)) = colsum(U) . colsum(V)
    nf = jnp.sum(cs[:, :k_pad] * cs[:, k_pad:])
    d_scale = 1.0 / (nf / jnp.float32(n) + 1e-6)
    vtz_scaled = vtz * d_scale              # U @ (D * vtz) == (U @ vtz) * D

    # --- Phase 2: emit [res * D, T] as lane-dense tiles, rows split by cores.
    emit_kernel = functools.partial(
        _lrga_emit_kernel, k_pad=k_pad, compute_dtype=compute_dtype)
    out_pad = pl.pallas_call(
        emit_kernel,
        out_shape=jax.ShapeDtypeStruct((n_pad, 2 * k_pad), jnp.float32),
        grid=grid,
        in_specs=[
            pl.BlockSpec((tm, d), lambda i: (i, 0)),
            pl.BlockSpec((d, 4 * k_pad), lambda i: (0, 0)),
            pl.BlockSpec((1, 4 * k_pad), lambda i: (0, 0)),
            pl.BlockSpec((k_pad, k_pad), lambda i: (0, 0)),
        ],
        out_specs=pl.BlockSpec((tm, 2 * k_pad), lambda i: (i, 0)),
        compiler_params=pltpu.CompilerParams(
            dimension_semantics=("parallel",),       # megacore-splittable
            vmem_limit_bytes=vmem_limit_bytes),
        cost_estimate=pl.CostEstimate(
            flops=proj_flops + lowrank_flops,
            transcendentals=0,
            bytes_accessed=x_bytes + param_bytes + 4 * n_pad * 2 * k_pad),
    )(x_in, w_in, b_pad, vtz_scaled)

    # Strip lane / row padding; concat([res * D, T], axis=1).
    return jnp.concatenate(
        [out_pad[:n, :k], out_pad[:n, k_pad:k_pad + k]], axis=1)


def lowrank_attention_ref(x, w, b, k):
    """Pure-JAX f32 reference matching the PyTorch module."""
    hp = lax.Precision.HIGHEST
    tmp = jnp.maximum(jnp.dot(x, w, precision=hp) + b, 0.0)
    U = tmp[:, :k]
    V = tmp[:, k:2 * k]
    Z = tmp[:, 2 * k:3 * k]
    T = tmp[:, 3 * k:]
    ones = jnp.ones((x.shape[0], 1), jnp.float32)
    nf = jnp.sum(jnp.dot(U, jnp.dot(V.T, ones, precision=hp), precision=hp))
    D = 1.0 / (nf / x.shape[0] + 1e-6)
    res = jnp.dot(U, jnp.dot(V.T, Z, precision=hp), precision=hp)
    return jnp.concatenate([res * D, T], axis=1)


if __name__ == "__main__":
    # Small graph: 640 nodes, d=64 features, rank k=16 (lane-padded to 128).
    # block_rows=256 -> 3-tile grid (640 padded to 768), exercising multi-tile
    # accumulation and the masked tail tile.
    N, d, k = 640, 64, 16

    key = jax.random.PRNGKey(0)
    kx, kw, kb = jax.random.split(key, 3)

    x = jax.random.normal(kx, (N, d), dtype=jnp.float32)
    xavier_std = (2.0 / (d + 4 * k)) ** 0.5
    w = xavier_std * jax.random.normal(kw, (d, 4 * k), dtype=jnp.float32)
    # Module init uses zero bias; a small non-zero bias also exercises the
    # masked-tail-row path (relu(bias) != 0 on padded rows).
    b = 0.1 * jax.random.normal(kb, (4 * k,), dtype=jnp.float32)

    out = lowrank_attention(x, w, b, k, block_rows=256)
    out = jax.block_until_ready(out)

    ref = lowrank_attention_ref(x, w, b, k)

    assert out.shape == (N, 2 * k)
    # bf16 MXU inputs with f32 accumulation -> small tolerance vs full-f32 ref.
    assert jnp.allclose(out, ref, atol=5e-2, rtol=5e-2), "mismatch vs reference"

    print("KERNEL_OK")
</pallas_src>

<mosaic_0001>
module attributes {stable_mosaic.version = 11 : i64} {
  func.func @_lrga_stats_kernel(%arg0: i32, %arg1: memref<256x64xbf16, #tpu.memory_space<vmem>>, %arg2: memref<64x512xbf16, #tpu.memory_space<vmem>>, %arg3: memref<1x512xf32, #tpu.memory_space<vmem>>, %arg4: memref<128x128xf32, #tpu.memory_space<vmem>>, %arg5: memref<1x256xf32, #tpu.memory_space<vmem>>) attributes {dimension_semantics = [#tpu.dimension_semantics<arbitrary>], iteration_bounds = array<i64: 3>, scalar_prefetch = 0 : i64, scratch_operands = 0 : i64, tpu.core_type = #tpu.core_type<tc>, window_params = [{transform_indices = @transform_0, window_bounds = array<i64: 256, 64>}, {pipeline_mode = #tpu.pipeline_mode<synchronous>, transform_indices = @transform_1, window_bounds = array<i64: 64, 512>}, {pipeline_mode = #tpu.pipeline_mode<synchronous>, transform_indices = @transform_2, window_bounds = array<i64: 1, 512>}, {pipeline_mode = #tpu.pipeline_mode<synchronous>, transform_indices = @transform_3, window_bounds = array<i64: 128, 128>}, {pipeline_mode = #tpu.pipeline_mode<synchronous>, transform_indices = @transform_4, window_bounds = array<i64: 1, 256>}]} {
    %c0_i32 = arith.constant 0 : i32
    %0 = arith.cmpi eq, %arg0, %c0_i32 : i32
    %1 = arith.extui %0 : i1 to i32
    %c0_i32_0 = arith.constant 0 : i32
    %2 = arith.cmpi ne, %1, %c0_i32_0 : i32
    scf.if %2 {
      %cst_18 = arith.constant 0.000000e+00 : f32
      %33 = vector.broadcast %cst_18 : f32 to vector<128x128xf32>
      %c0_19 = arith.constant 0 : index
      %c0_20 = arith.constant 0 : index
      %34 = vector.load %arg4[%c0_19, %c0_20] : memref<128x128xf32, #tpu.memory_space<vmem>>, vector<128x128xf32>
      tpu.vector_store %arg4[%c0_19, %c0_20], %33 {strides = array<i32>} : memref<128x128xf32, #tpu.memory_space<vmem>>, vector<128x128xf32>,
      %cst_21 = arith.constant 0.000000e+00 : f32
      %35 = vector.broadcast %cst_21 : f32 to vector<1x256xf32>
      %c0_22 = arith.constant 0 : index
      %c0_23 = arith.constant 0 : index
      %36 = vector.load %arg5[%c0_22, %c0_23] : memref<1x256xf32, #tpu.memory_space<vmem>>, vector<1x256xf32>
      tpu.vector_store %arg5[%c0_22, %c0_23], %35 {strides = array<i32>} : memref<1x256xf32, #tpu.memory_space<vmem>>, vector<1x256xf32>,
    } else {
    }
    %c0 = arith.constant 0 : index
    %c0_1 = arith.constant 0 : index
    %3 = vector.load %arg1[%c0, %c0_1] : memref<256x64xbf16, #tpu.memory_space<vmem>>, vector<256x64xbf16>
    %c0_2 = arith.constant 0 : index
    %c0_3 = arith.constant 0 : index
    %4 = vector.load %arg2[%c0_2, %c0_3] : memref<64x512xbf16, #tpu.memory_space<vmem>>, vector<64x512xbf16>
    %cst = arith.constant dense<0.000000e+00> : vector<256x512xf32>
    %5 = tpu.matmul %3, %4, %cst {dimension_numbers = #tpu.dot_dimension_numbers<[1], [0], [0], [1], [0, 0, 1, 1], [], []>} : vector<256x64xbf16>, vector<64x512xbf16>, vector<256x512xf32> -> vector<256x512xf32>
    %c0_4 = arith.constant 0 : index
    %c0_5 = arith.constant 0 : index
    %6 = vector.load %arg3[%c0_4, %c0_5] : memref<1x512xf32, #tpu.memory_space<vmem>>, vector<1x512xf32>
    %7 = vector.broadcast %6 : vector<1x512xf32> to vector<256x512xf32>
    %8 = arith.addf %5, %7 : vector<256x512xf32>
    %cst_6 = arith.constant 0.000000e+00 : f32
    %9 = vector.broadcast %cst_6 : f32 to vector<256x512xf32>
    %10 = arith.maximumf %8, %9 : vector<256x512xf32>
    %c256_i32 = arith.constant 256 : i32
    %11 = arith.muli %arg0, %c256_i32 : i32
    %12 = tpu.iota {dimensions = array<i32: 0>} : vector<256x1xi32>
    %13 = vector.broadcast %11 : i32 to vector<256x1xi32>
    %14 = arith.addi %13, %12 : vector<256x1xi32>
    %c640_i32 = arith.constant 640 : i32
    %15 = vector.broadcast %c640_i32 : i32 to vector<256x1xi32>
    %16 = arith.cmpi slt, %14, %15 : vector<256x1xi32>
    %cst_7 = arith.constant 0.000000e+00 : f32
    %17 = vector.shape_cast %16 : vector<256x1xi1> to vector<256x1xi1>
    %18 = vector.broadcast %17 : vector<256x1xi1> to vector<256x512xi1>
    %19 = vector.broadcast %cst_7 : f32 to vector<256x512xf32>
    %20 = arith.select %18, %10, %19 : vector<256x512xi1>, vector<256x512xf32>
    %21 = vector.extract_strided_slice %20 {offsets = [0, 128], sizes = [256, 128], strides = [1, 1]} : vector<256x512xf32> to vector<256x128xf32>
    %22 = vector.extract_strided_slice %20 {offsets = [0, 256], sizes = [256, 128], strides = [1, 1]} : vector<256x512xf32> to vector<256x128xf32>
    %c0_8 = arith.constant 0 : index
    %c0_9 = arith.constant 0 : index
    %23 = vector.load %arg4[%c0_8, %c0_9] : memref<128x128xf32, #tpu.memory_space<vmem>>, vector<128x128xf32>
    %cst_10 = arith.constant dense<0.000000e+00> : vector<128x128xf32>
    %24 = tpu.matmul %21, %22, %cst_10 {dimension_numbers = #tpu.dot_dimension_numbers<[0], [0], [1], [1], [0, 1, 1, 1], [], []>} : vector<256x128xf32>, vector<256x128xf32>, vector<128x128xf32> -> vector<128x128xf32>
    %25 = arith.addf %23, %24 : vector<128x128xf32>
    %c0_11 = arith.constant 0 : index
    %c0_12 = arith.constant 0 : index
    %26 = vector.load %arg4[%c0_11, %c0_12] : memref<128x128xf32, #tpu.memory_space<vmem>>, vector<128x128xf32>
    tpu.vector_store %arg4[%c0_11, %c0_12], %25 {strides = array<i32>} : memref<128x128xf32, #tpu.memory_space<vmem>>, vector<128x128xf32>,
    %c0_13 = arith.constant 0 : index
    %c0_14 = arith.constant 0 : index
    %27 = vector.load %arg5[%c0_13, %c0_14] : memref<1x256xf32, #tpu.memory_space<vmem>>, vector<1x256xf32>
    %28 = vector.extract_strided_slice %20 {offsets = [0, 0], sizes = [256, 256], strides = [1, 1]} : vector<256x512xf32> to vector<256x256xf32>
    %cst_15 = arith.constant dense<0.000000e+00> : vector<256xf32>
    %29 = vector.multi_reduction <add>, %28, %cst_15 [0] : vector<256x256xf32> to vector<256xf32>
    %30 = vector.shape_cast %29 : vector<256xf32> to vector<1x256xf32>
    %31 = arith.addf %27, %30 : vector<1x256xf32>
    %c0_16 = arith.constant 0 : index
    %c0_17 = arith.constant 0 : index
    %32 = vector.load %arg5[%c0_16, %c0_17] : memref<1x256xf32, #tpu.memory_space<vmem>>, vector<1x256xf32>
    tpu.vector_store %arg5[%c0_16, %c0_17], %31 {strides = array<i32>} : memref<1x256xf32, #tpu.memory_space<vmem>>, vector<1x256xf32>,
    return
  }
  func.func @transform_0(%arg0: i32) -> (i32, i32) {
    %c0_i32 = arith.constant 0 : i32
    %c0_i32_0 = arith.constant 0 : i32
    return %arg0, %c0_i32 : i32, i32
  }
  func.func @transform_1(%arg0: i32) -> (i32, i32) {
    %c0_i32 = arith.constant 0 : i32
    %c0_i32_0 = arith.constant 0 : i32
    %c0_i32_1 = arith.constant 0 : i32
    return %c0_i32, %c0_i32_0 : i32, i32
  }
  func.func @transform_2(%arg0: i32) -> (i32, i32) {
    %c0_i32 = arith.constant 0 : i32
    %c0_i32_0 = arith.constant 0 : i32
    %c0_i32_1 = arith.constant 0 : i32
    return %c0_i32, %c0_i32_0 : i32, i32
  }
  func.func @transform_3(%arg0: i32) -> (i32, i32) {
    %c0_i32 = arith.constant 0 : i32
    %c0_i32_0 = arith.constant 0 : i32
    %c0_i32_1 = arith.constant 0 : i32
    return %c0_i32, %c0_i32_0 : i32, i32
  }
  func.func @transform_4(%arg0: i32) -> (i32, i32) {
    %c0_i32 = arith.constant 0 : i32
    %c0_i32_0 = arith.constant 0 : i32
    %c0_i32_1 = arith.constant 0 : i32
    return %c0_i32, %c0_i32_0 : i32, i32
  }
}

</mosaic_0001>

<bundles_post_ra>
// kernel: tpu_custom_call.1
= control target key start
LH: loop header
LB: loop body
LE: loop exit
PB: predicated region body
PF: predicated region fallthrough
CT: control target
= control target key end

     0   :  { %10 = vsyncpa [#allocation3], 0  ;;  %s3045_s0 = inlined_call_operand.vmem [shape: bf16[768,64], index: 0, kind: input, shape index: {}]   ;;  %s3046_s1 = inlined_call_operand.vmem [shape: bf16[64,512], index: 1, kind: input, shape index: {}]   ;;  %s3047_s2 = inlined_call_operand.vmem [shape: f32[1,512], index: 2, kind: input, shape index: {}]   ;;  %s3048_s3 = inlined_call_operand.hbm [shape: f32[128,128], index: 3, kind: output, shape index: {0}]   ;;  %s3049_s4 = inlined_call_operand.hbm [shape: f32[1,256], index: 4, kind: output, shape index: {1}]  }
   0x1   :  { %11 = vsyncpa [#allocation5], 0  ;;  %s2145_s15 = smov 0  }
   0x2 LB: > { %s2151_s16 = sadd.s32 4294967295, %s2111_s15   ;;  %p1623_p0 = scmp.ge.s32.totalorder %s2111_s15, 1  ;;  %s2111_s15 = sphi %s2145_s15, %s17_s15  }
   0x3   : > { %p158_p1 = scmp.lt.s32.totalorder %s2111_s15, 4 }
   0x5   : > { %p159_p2 = pnand %p1623_p0, %p158_p1 }
   0x7   : > { %162 = sbr.rel (%p159_p2) target bundleno = 754 (0x2f2), region = 32 }
   0xe   : > { %s1624_s17 = sshll.u32 %s2151_s16, 5  ;;  %p1626_p4 = scmp.ne.s32.totalorder %s2151_s16, 0 }
   0xf   : > { %p180_p3 = scmp.lt.s32.totalorder %s1624_s17, 95  ;;  %v206_v0 = vlaneseq (!%p1626_p4)  ;;  %v2113_v1 = vmov (!%p1626_p4), 0.0  }
  0x10   : > { %189 = sbr.rel (%p1626_p4) target bundleno = 25 (0x19), region = 36  ;;  %190 = vst [vmem:[#allocation2] sm:$0xff] (!%p1626_p4), %v2113_v1  ;;  %191 = vst [vmem:[#allocation2 + $0x8] sm:$0xff] (!%p1626_p4), %v2113_v1 }
  0x11   : > { %s3167_s17 = smov (!%p180_p3, %s1624_s17), 95  ;;  %192 = vst [vmem:[#allocation2 + $0x10] sm:$0xff] (!%p1626_p4), %v2113_v1  ;;  %193 = vst [vmem:[#allocation2 + $0x18] sm:$0xff] (!%p1626_p4), %v2113_v1  ;;  %vm208_vm0 = vcmp.lt.s32.totalorder (!%p1626_p4), %v206_v0, 256 }
  0x12   : > { %s1625_s18 = sshll.u32 %s3167_s17, 2  ;;  %194 = vst [vmem:[#allocation2 + $0x20] sm:$0xff] (!%p1626_p4), %v2113_v1  ;;  %195 = vst [vmem:[#allocation2 + $0x28] sm:$0xff] (!%p1626_p4), %v2113_v1 }
  0x13   : > { %s2159_s21 = scalar_lea.vmem %s3045_s0, %s1625_s18  ;;  %196 = vst [vmem:[#allocation2 + $0x30] sm:$0xff] (!%p1626_p4), %v2113_v1  ;;  %197 = vst [vmem:[#allocation2 + $0x38] sm:$0xff] (!%p1626_p4), %v2113_v1 }
  0x14   : > { %198 = vst [vmem:[#allocation2 + $0x40] sm:$0xff] (!%p1626_p4), %v2113_v1  ;;  %199 = vst [vmem:[#allocation2 + $0x48] sm:$0xff] (!%p1626_p4), %v2113_v1 }
  0x15   : > { %200 = vst [vmem:[#allocation2 + $0x50] sm:$0xff] (!%p1626_p4), %v2113_v1  ;;  %201 = vst [vmem:[#allocation2 + $0x58] sm:$0xff] (!%p1626_p4), %v2113_v1 }
  0x16   : > { %202 = vst [vmem:[#allocation2 + $0x60] sm:$0xff] (!%p1626_p4), %v2113_v1  ;;  %203 = vst [vmem:[#allocation2 + $0x68] sm:$0xff] (!%p1626_p4), %v2113_v1 }
  0x17   : > { %204 = vst [vmem:[#allocation2 + $0x70] sm:$0xff] %v2113_v1  ;;  %205 = vst [vmem:[#allocation2 + $0x78] sm:$0xff] %v2113_v1 }
  0x18   : > { %210 = vst.msk [vmem:[#allocation4] sm:$0x3] %vm208_vm0, %v2113_v1 }
  0x19 PF: > { %v2005_v2 = vld [vmem:[%s3046_s1 + $0x4] ss:$16 sps:$4 sm:$0xff]   ;;  %v2007_v3 = vld [vmem:[%s3046_s1] ss:$16 sps:$4 sm:$0xff]   ;;  %v2114_v4 = vmov 0   ;;  %vm436_vm1 = vcmask 523264   ;;  %v3054_v35 = vlaneseq }
  0x1a   : > { %517 = vmatprep.mubr.bf16.mxu0 %v2114_v4  ;;  %637 = vmatprep.mubr.bf16.mxu1 %v2114_v4  ;;  %v2008_v5 = vld [vmem:[%s3046_s1 + $0x24] ss:$16 sps:$4 sm:$0xff]   ;;  %v2010_v6 = vld [vmem:[%s3046_s1 + $0x20] ss:$16 sps:$4 sm:$0xff]   ;;  %v2025_v11 = vld [vmem:[%s3046_s1 + $0xc] ss:$16 sps:$4 sm:$0xff]  }
  0x1b   : > { %485 = vmatprep.subr.bf16.mxu0 %v2005_v2  ;;  %1858 = vmatprep.subr.bf16.mxu1 %v2005_v2  ;;  %v2011_v7 = vld [vmem:[%s3046_s1 + $0x44] ss:$16 sps:$4 sm:$0xff]   ;;  %v2013_v8 = vld [vmem:[%s3046_s1 + $0x40] ss:$16 sps:$4 sm:$0xff]   ;;  %v2023_v14 = vld [vmem:[%s3046_s1 + $0x8] ss:$16 sps:$4 sm:$0xff]  }
  0x1c   : > { %486 = vmatpush1.bf16.msra.mxu0 %v2007_v3  ;;  %1862 = vmatpush1.bf16.msra.mxu1 %v2007_v3  ;;  %v2014_v9 = vld [vmem:[%s3046_s1 + $0x64] ss:$16 sps:$4 sm:$0xff]   ;;  %v2016_v10 = vld [vmem:[%s3046_s1 + $0x60] ss:$16 sps:$4 sm:$0xff]   ;;  %v2028_v15 = vld [vmem:[%s3046_s1 + $0x2c] ss:$16 sps:$4 sm:$0xff]  }
  0x1d   : > { %487 = vmatprep.subr.bf16.mxu0 %v2008_v5  ;;  %1859 = vmatprep.subr.bf16.mxu1 %v2008_v5  ;;  %v2017_v12 = vld [vmem:[%s2159_s21] sm:$0xff]   ;;  %v2019_v16 = vld [vmem:[%s2159_s21 + $0x8] sm:$0xff]   ;;  %v2021_v23 = vld [vmem:[%s2159_s21 + $0x10] sm:$0xff]   ;;  %v2303_v36 = vshrl.u32 %v3054_v35, 7  ;;  %v3085_v57 = vmov 0  ;;  %p1874_p5 = scmp.eq.s32.totalorder %s2151_s16, 2 }
  0x1e   : > { %v2193_v13 = vld [vmem:[%s2159_s21 + $0x60] sm:$0xff]   ;;  %v2026_v17 = vld [vmem:[%s3046_s1 + $0x28] ss:$16 sps:$4 sm:$0xff]   ;;  %v2033_v18 = vld [vmem:[%s3046_s1 + $0x4c] ss:$16 sps:$4 sm:$0xff]   ;;  %s2116_s7 = smov [#allocation4]  }
  0x1f   : > { %v2214_v19 = vld [vmem:[%s2159_s21 + $0x68] sm:$0xff]   ;;  %v2232_v24 = vld [vmem:[%s2159_s21 + $0x70] sm:$0xff]   ;;  %v2029_v25 = vld [vmem:[%s2159_s21 + $0x18] sm:$0xff]   ;;  %v943_v37 = vadd.s32 48, %v2303_v36  ;;  %v944_v38 = vadd.s32 56, %v2303_v36  ;;  %v263_v39 = vsub.s32 0, %v2303_v36 }
  0x20   : > { %488 = vmatpush1.bf16.msra.mxu0 %v2010_v6  ;;  %1863 = vmatpush1.bf16.msra.mxu1 %v2010_v6  ;;  %v2031_v20 = vld [vmem:[%s3046_s1 + $0x48] ss:$16 sps:$4 sm:$0xff]   ;;  %v2036_v21 = vld [vmem:[%s3046_s1 + $0x6c] ss:$16 sps:$4 sm:$0xff]   ;;  %v2037_v27 = vld [vmem:[%s2159_s21 + $0x20] sm:$0xff]   ;;  %v267_v41 = vsub.s32 1, %v2303_v36 }
  0x21   : > { %489 = vmatprep.subr.bf16.mxu0 %v2011_v7  ;;  %1860 = vmatprep.subr.bf16.mxu1 %v2011_v7  ;;  %v2034_v22 = vld [vmem:[%s3046_s1 + $0x68] ss:$16 sps:$4 sm:$0xff]   ;;  %v2039_v29 = vld [vmem:[%s2159_s21 + $0x30] sm:$0xff]   ;;  %v2041_v31 = vld [vmem:[%s2159_s21 + $0x40] sm:$0xff]   ;;  %v938_v43 = vadd.s32 8, %v2303_v36  ;;  %v945_v48 = vadd.s32 64, %v2303_v36 }
  0x22   : > { %v2030_v26 = vld [vmem:[%s2159_s21 + $0x78] sm:$0xff]   ;;  %v2038_v28 = vld [vmem:[%s2159_s21 + $0x28] sm:$0xff]   ;;  %v2043_v33 = vld [vmem:[%s2159_s21 + $0x50] sm:$0xff]   ;;  %v946_v53 = vadd.s32 72, %v2303_v36  ;;  %v939_v61 = vadd.s32 16, %v2303_v36  ;;  %v940_v62 = vadd.s32 24, %v2303_v36 }
  0x23   : > { %v2040_v30 = vld [vmem:[%s2159_s21 + $0x38] sm:$0xff]   ;;  %v2042_v32 = vld [vmem:[%s2159_s21 + $0x48] sm:$0xff]   ;;  %v2312_v40 = vld [vmem:[%s3047_s2] sm:$0xf]  ;;  %s1570_s8 = sshll.u32 %s2116_s7, 4  ;;  %s1571_s8 = int_to_ptr.vmem [resolvable:$true] %s1570_s8 }
  0x24   : > { %490 = vmatpush1.bf16.msra.mxu0 %v2013_v8  ;;  %1864 = vmatpush1.bf16.msra.mxu1 %v2013_v8  ;;  %v2044_v34 = vld [vmem:[%s2159_s21 + $0x58] sm:$0xff]   ;;  %s1691_s21 = sshll.u32 %s2151_s16, 8  ;;  %v2325_v46 = vrot.slane %v2312_v40, %v263_v39  ;;  %v2328_v47 = vrot.slane %v2312_v40, %v267_v41  ;;  %s2045_s9 = scalar_lea.vmem %s1571_s8, 32 }
  0x25   : > { %491 = vmatprep.subr.bf16.mxu0 %v2014_v9  ;;  %1861 = vmatprep.subr.bf16.mxu1 %v2014_v9  ;;  %v2315_v42 = vstv %s1691_s21  ;;  %p2046_p6 = scmp.ne.s32.totalorder %s1571_s8, %s2045_s9  ;;  %p2052_p9 = scmp.lt.s32.totalorder %s1571_s8, %s1571_s8 }
  0x26   : > { %v2319_v44 = vadd.s32 %v2315_v42, %v943_v37  ;;  %v2322_v45 = vadd.s32 %v2315_v42, %v944_v38  ;;  %v2333_v49 = vadd.s32 %v2315_v42, %v2303_v36  ;;  %v2338_v52 = vadd.s32 %v2315_v42, %v938_v43  ;;  %p2053_p10 = scmp.lt.s32.totalorder %s2045_s9, %s2045_s9 }
  0x27   : > { %v2360_v63 = vadd.s32 %v2315_v42, %v945_v48  ;;  %v2369_v6 = vadd.s32 %v2315_v42, %v946_v53  ;;  %v2372_v9 = vadd.s32 %v2315_v42, %v939_v61  ;;  %p2047_p7 = pnand %p2046_p6, %p1874_p5 }
  0x28   : > { %492 = vmatpush1.bf16.msra.mxu0 %v2016_v10  ;;  %1865 = vmatpush1.bf16.msra.mxu1 %v2016_v10  ;;  %vm1008_vm2 = vcmp.lt.s32.totalorder %v2319_v44, 640  ;;  %vm1009_vm3 = vcmp.lt.s32.totalorder %v2322_v45, 640  ;;  %vm3060_vm5 = vcmp.lt.s32.totalorder %v2333_v49, 640  ;;  %vm3059_vm6 = vcmp.lt.s32.totalorder %v2338_v52, 640  ;;  %p2054_p11 = por %p2053_p10, %p2052_p9 }
  0x29   : > { %678 = vmatprep.subr.bf16.mxu1 %v2025_v11  ;;  %vm2350_vm4 = vmpackc.low %vm1009_vm3, %vm1008_vm2  ;;  %3088 = vst [vmem:[#allocation9_spill] sm:$0xff] %v2372_v9  ;;  %v2375_v10 = vadd.s32 %v2315_v42, %v940_v62  ;;  %vm1010_vm7 = vcmp.lt.s32.totalorder %v2360_v63, 640  ;;  %vm1011_vm8 = vcmp.lt.s32.totalorder %v2369_v6, 640  ;;  %vm3053_vm10 = vcmp.lt.s32.totalorder %v2372_v9, 640  ;;  %p2048_p8 = pneg %p2047_p7 }
  0x2a   : > { %v3086_v57 = vsel %vm2350_vm4, 4294967295, %v3085_v57  ;;  %vm2405_vm9 = vmpackc.low %vm1011_vm8, %vm1010_vm7  ;;  %v3101_v45 = vmov 0 }
  0x2b   : > { %1659 = vmatmul.mubr.msk.bf16.vlgmr.msra.gmra.mrb[0].mxu0 %vm436_vm1, %v2017_v12  ;;  %1671 = vmatmul.mubr.msk.bf16.vlgmr.msra.gmra.mrb[0].mxu1 %vm436_vm1, %v2193_v13  ;;  %3087 = vst [vmem:[#allocation8_spill] sm:$0xff] %v3086_v57  ;;  %3089 = vst [vmem:[#allocation10_spill] sm:$0xff] %v2375_v10  ;;  %vm3052_vm11 = vcmp.lt.s32.totalorder %v2375_v10, 640  ;;  %p2055_p12 = pnand %p2054_p11, %p2048_p8 }
  0x2c   : > { %527 = vmatprep.mubr.bf16.mxu0 %v2114_v4  ;;  %647 = vmatprep.mubr.bf16.mxu1 %v2114_v4 }
  0x2d   : > { %679 = vmatpush1.bf16.msra.mxu1 %v2023_v14  ;;  %v948_v14 = vadd.s32 88, %v2303_v36 }
  0x2e   : > { %680 = vmatprep.subr.bf16.mxu1 %v2028_v15 }
  0x2f   : > { %v2421_v37 = vadd.s32 %v2315_v42, %v948_v14  ;;  %v3095_v14 = vmov 0 }
  0x31   : > { %681 = vmatpush1.bf16.msra.mxu1 %v2026_v17  ;;  %vm1013_vm13 = vcmp.lt.s32.totalorder %v2421_v37, 640 }
  0x32   : > { %682 = vmatprep.subr.bf16.mxu1 %v2033_v18 }
  0x33   : > { %1660 = vmatmul.mubr.msk.bf16.gmra.mrb[4].mxu0 %vm436_vm1, %v2019_v16  ;;  %1672 = vmatmul.mubr.msk.bf16.gmra.mrb[4].mxu1 %vm436_vm1, %v2214_v19 }
  0x34   : > { %537 = vmatprep.mubr.bf16.mxu0 %v2114_v4  ;;  %657 = vmatprep.mubr.bf16.mxu1 %v2114_v4 }
  0x35   : > { %683 = vmatpush1.bf16.msra.mxu1 %v2031_v20 }
  0x36   : > { %684 = vmatprep.subr.bf16.mxu1 %v2036_v21 }
  0x39   : > { %685 = vmatpush1.bf16.msra.mxu1 %v2034_v22 }
  0x3b   : > { %1661 = vmatmul.mubr.msk.bf16.gmra.mrb[8].mxu0 %vm436_vm1, %v2021_v23  ;;  %1673 = vmatmul.mubr.msk.bf16.gmra.mrb[8].mxu1 %vm436_vm1, %v2232_v24 }
  0x3c   : > { %547 = vmatprep.mubr.bf16.mxu0 %v2114_v4  ;;  %667 = vmatprep.mubr.bf16.mxu1 %v2114_v4 }
  0x43   : > { %1662 = vmatmul.mubr.msk.bf16.gmra.mrb[12].mxu0 %vm436_vm1, %v2029_v25  ;;  %1674 = vmatmul.mubr.msk.bf16.gmra.mrb[12].mxu1 %vm436_vm1, %v2030_v26 }
  0x44   : > { %557 = vmatprep.mubr.bf16.mxu0 %v2114_v4  ;;  %710 = vmatprep.mubr.bf16.mxu1 %v2114_v4 }
  0x4b   : > { %1663 = vmatmul.mubr.msk.bf16.gmra.mrb[16].mxu0 %vm436_vm1, %v2037_v27  ;;  %1675 = vmatmul.mubr.msk.bf16.vlgmr.msra.gmra.mrb[16].mxu1 %vm436_vm1, %v2017_v12 }
  0x4c   : > { %567 = vmatprep.mubr.bf16.mxu0 %v2114_v4  ;;  %718 = vmatprep.mubr.bf16.mxu1 %v2114_v4 }
  0x53   : > { %1664 = vmatmul.mubr.msk.bf16.gmra.mrb[20].mxu0 %vm436_vm1, %v2038_v28  ;;  %1676 = vmatmul.mubr.msk.bf16.gmra.mrb[20].mxu1 %vm436_vm1, %v2019_v16 }
  0x54   : > { %577 = vmatprep.mubr.bf16.mxu0 %v2114_v4  ;;  %726 = vmatprep.mubr.bf16.mxu1 %v2114_v4 }
  0x5b   : > { %1665 = vmatmul.mubr.msk.bf16.gmra.mrb[24].mxu0 %vm436_vm1, %v2039_v29  ;;  %1677 = vmatmul.mubr.msk.bf16.gmra.mrb[24].mxu1 %vm436_vm1, %v2021_v23  ;;  %v941_v23 = vadd.s32 32, %v2303_v36 }
  0x5c   : > { %587 = vmatprep.mubr.bf16.mxu0 %v2114_v4  ;;  %734 = vmatprep.mubr.bf16.mxu1 %v2114_v4 }
  0x5d   : > { %v2428_v48 = vadd.s32 %v2315_v42, %v941_v23 }
  0x5f   : > { %3093 = vst [vmem:[#allocation12_spill] sm:$0xff] %v2428_v48  ;;  %vm3050_vm15 = vcmp.lt.s32.totalorder %v2428_v48, 640 }
  0x63   : > { %1666 = vmatmul.mubr.msk.bf16.gmra.mrb[28].mxu0 %vm436_vm1, %v2040_v30  ;;  %1678 = vmatmul.mubr.msk.bf16.gmra.mrb[28].mxu1 %vm436_vm1, %v2029_v25  ;;  %v3090_v25 = vmov 0 }
  0x64   : > { %597 = vmatprep.mubr.bf16.mxu0 %v2114_v4  ;;  %742 = vmatprep.mubr.bf16.mxu1 %v2114_v4  ;;  %v3091_v25 = vsel %vm2405_vm9, 4294967295, %v3090_v25 }
  0x65   : > { %3092 = vst [vmem:[#allocation11_spill] sm:$0xff] %v3091_v25 }
  0x6b   : > { %1667 = vmatmul.mubr.msk.bf16.gmra.mrb[32].mxu0 %vm436_vm1, %v2041_v31  ;;  %1679 = vmatmul.mubr.msk.bf16.gmra.mrb[32].mxu1 %vm436_vm1, %v2037_v27 }
  0x6c   : > { %607 = vmatprep.mubr.bf16.mxu0 %v2114_v4  ;;  %750 = vmatprep.mubr.bf16.mxu1 %v2114_v4 }
  0x73   : > { %1668 = vmatmul.mubr.msk.bf16.gmra.mrb[36].mxu0 %vm436_vm1, %v2042_v32  ;;  %1680 = vmatmul.mubr.msk.bf16.gmra.mrb[36].mxu1 %vm436_vm1, %v2038_v28 }
  0x74   : > { %617 = vmatprep.mubr.bf16.mxu0 %v2114_v4  ;;  %758 = vmatprep.mubr.bf16.mxu1 %v2114_v4 }
  0x7b   : > { %1669 = vmatmul.mubr.msk.bf16.gmra.mrb[40].mxu0 %vm436_vm1, %v2043_v33  ;;  %1681 = vmatmul.mubr.msk.bf16.gmra.mrb[40].mxu1 %vm436_vm1, %v2039_v29  ;;  %v942_v29 = vadd.s32 40, %v2303_v36 }
  0x7c   : > { %627 = vmatprep.mubr.bf16.mxu0 %v2114_v4  ;;  %766 = vmatprep.mubr.bf16.mxu1 %v2114_v4 }
  0x83   : > { %1670 = vmatmul.mubr.msk.bf16.gmra.mrb[44].mxu0 %vm436_vm1, %v2044_v34  ;;  %1682 = vmatmul.mubr.msk.bf16.gmra.mrb[44].mxu1 %vm436_vm1, %v2040_v30 }
  0x84   : > { %774 = vmatprep.mubr.bf16.mxu1 %v2114_v4 }
  0x8b   : > { %1683 = vmatmul.mubr.msk.bf16.gmra.mrb[48].mxu1 %vm436_vm1, %v2041_v31 }
  0x8c   : > { %782 = vmatprep.mubr.bf16.mxu1 %v2114_v4 }
  0x93   : > { %1684 = vmatmul.mubr.msk.bf16.gmra.mrb[52].mxu1 %vm436_vm1, %v2042_v32 }
  0x94   : > { %790 = vmatprep.mubr.bf16.mxu1 %v2114_v4 }
  0x9b   : > { %1685 = vmatmul.mubr.msk.bf16.gmra.mrb[56].mxu1 %vm436_vm1, %v2043_v33 }
  0x9c   : > { %798 = vmatprep.mubr.bf16.mxu1 %v2114_v4 }
  0xa3   : > { %1686 = vmatmul.mubr.msk.bf16.gmra.mrb[60].mxu1 %vm436_vm1, %v2044_v34 }
  0xa4   : > { %806 = vmatprep.mubr.bf16.mxu1 %v2114_v4 }
  0xab   : > { %1687 = vmatmul.mubr.msk.bf16.gmra.mrb[64].mxu1 %vm436_vm1, %v2193_v13  ;;  %v947_v13 = vadd.s32 80, %v2303_v36 }
  0xac   : > { %814 = vmatprep.mubr.bf16.mxu1 %v2114_v4 }
  0xad   : > { %v2418_v34 = vadd.s32 %v2315_v42, %v947_v13 }
  0xaf   : > { %vm1012_vm12 = vcmp.lt.s32.totalorder %v2418_v34, 640 }
  0xb0   : > { %vm2460_vm14 = vmpackc.low %vm1013_vm13, %vm1012_vm12 }
  0xb1   : > { %v3096_v14 = vsel %vm2460_vm14, 4294967295, %v3095_v14 }
  0xb2   : > { %3097 = vst [vmem:[#allocation14_spill] sm:$0xff] %v3096_v14 }
  0xb3   : > { %1688 = vmatmul.mubr.msk.bf16.gmra.mrb[68].mxu1 %vm436_vm1, %v2214_v19 }
  0xb4   : > { %822 = vmatprep.mubr.bf16.mxu1 %v2114_v4 }
  0xbb   : > { %1689 = vmatmul.mubr.msk.bf16.gmra.mrb[72].mxu1 %vm436_vm1, %v2232_v24 }
  0xbc   : > { %830 = vmatprep.mubr.bf16.mxu1 %v2114_v4 }
  0xc3   : > { %1690 = vmatmul.mubr.msk.bf16.gmra.mrb[76].mxu1 %vm436_vm1, %v2030_v26 }
  0xfe   : > { %v519_v50 = vpop.f32.mrb[0].mxu0  ;;  %v2335_v51 = vpop.f32.mrb[0].mxu1 }
  0xff   : > { %v520_v54 = vadd.f32 %v519_v50, %v2325_v46  ;;  %v521_v55 = vpop.f32.mrb[1].mxu0  ;;  %v2344_v56 = vpop.f32.mrb[1].mxu1 }
 0x100   : > { %v522_v58 = vadd.f32 %v521_v55, %v2328_v47  ;;  %v523_v59 = vpop.f32.mrb[2].mxu0  ;;  %v2355_v60 = vpop.f32.mrb[2].mxu1  ;;  %v2435_v55 = vadd.s32 %v2315_v42, %v942_v29 }
 0x101   : > { %v839_v0 = vmax.f32 %v520_v54, 0.0  ;;  %v524_v1 = vadd.f32 %v523_v59, %v2325_v46  ;;  %v525_v2 = vpop.f32.mrb[3].mxu0  ;;  %v2364_v3 = vpop.f32.mrb[3].mxu1 }
 0x102   : > { %v840_v4 = vmax.f32 %v522_v58, 0.0  ;;  %v526_v5 = vadd.f32 %v525_v2, %v2328_v47  ;;  %3094 = vst [vmem:[#allocation13_spill] sm:$0xff] %v2435_v55  ;;  %v949_v2 = vadd.s32 96, %v2303_v36  ;;  %vm3051_vm0 = vcmp.lt.s32.totalorder %v2435_v55, 640 }
 0x103   : > { %v842_v7 = vmax.f32 %v524_v1, 0.0  ;;  %v1098_v11 = vsel %vm3060_vm5, %v839_v0, 0.0 }
 0x104   : > { %v843_v8 = vmax.f32 %v526_v5, 0.0  ;;  %v2389_v18 = vsel %vm3060_vm5, %v840_v4, 0.0  ;;  %v950_v4 = vadd.s32 104, %v2303_v36  ;;  %v961_v5 = vadd.s32 192, %v2303_v36 }
 0x105   : > { %v1101_v12 = vsel %vm3059_vm6, %v842_v7, 0.0  ;;  %v962_v7 = vadd.s32 200, %v2303_v36 }
 0x106   : > { %v1452_v15 = vadd.f32 %v1101_v12, %v1098_v11  ;;  %v529_v16 = vpop.f32.mrb[4].mxu0  ;;  %v2384_v17 = vpop.f32.mrb[4].mxu1  ;;  %v2393_v19 = vsel %vm3059_vm6, %v843_v8, 0.0 }
 0x107   : > { %v530_v20 = vadd.f32 %v529_v16, %v2325_v46  ;;  %v531_v21 = vpop.f32.mrb[5].mxu0  ;;  %v2396_v22 = vpop.f32.mrb[5].mxu1  ;;  %v1489_v24 = vadd.f32 %v2393_v19, %v2389_v18 }
 0x108   : > { %v532_v26 = vadd.f32 %v531_v21, %v2328_v47  ;;  %v533_v27 = vpop.f32.mrb[6].mxu0  ;;  %v2411_v28 = vpop.f32.mrb[6].mxu1 }
 0x109   : > { %v845_v30 = vmax.f32 %v530_v20, 0.0  ;;  %v534_v31 = vadd.f32 %v533_v27, %v2325_v46  ;;  %v535_v32 = vpop.f32.mrb[7].mxu0  ;;  %v2415_v33 = vpop.f32.mrb[7].mxu1 }
 0x10a   : > { %v846_v38 = vmax.f32 %v532_v26, 0.0  ;;  %v536_v39 = vadd.f32 %v535_v32, %v2328_v47  ;;  %v2480_v32 = vadd.s32 %v2315_v42, %v961_v5 }
 0x10b   : > { %v1104_v41 = vsel %vm3053_vm10, %v845_v30, 0.0  ;;  %v848_v43 = vmax.f32 %v534_v31, 0.0  ;;  %v2474_v30 = vadd.s32 %v2315_v42, %v949_v2  ;;  %v2477_v31 = vadd.s32 %v2315_v42, %v950_v4 }
 0x10c   : > { %v1453_v50 = vadd.f32 %v1452_v15, %v1104_v41  ;;  %v2432_v53 = vsel %vm3053_vm10, %v846_v38, 0.0  ;;  %v849_v54 = vmax.f32 %v536_v39, 0.0  ;;  %v2483_v38 = vadd.s32 %v2315_v42, %v962_v7 }
 0x10d   : > { %v1107_v58 = vsel %vm3052_vm11, %v848_v43, 0.0  ;;  %v1490_v59 = vadd.f32 %v1489_v24, %v2432_v53  ;;  %v963_v43 = vadd.s32 208, %v2303_v36  ;;  %v952_v2 = vadd.s32 120, %v2303_v36 }
 0x10e   : > { %v1454_v61 = vadd.f32 %v1453_v50, %v1107_v58  ;;  %v2444_v62 = vsel %vm3052_vm11, %v849_v54, 0.0  ;;  %v539_v0 = vpop.f32.mrb[8].mxu0  ;;  %v2446_v1 = vpop.f32.mrb[8].mxu1  ;;  %vm1014_vm1 = vcmp.lt.s32.totalorder %v2474_v30, 640  ;;  %vm3082_vm11 = vcmp.lt.s32.totalorder %v2480_v32, 640 }
 0x10f   : > { %v540_v8 = vadd.f32 %v539_v0, %v2325_v46  ;;  %v541_v11 = vpop.f32.mrb[9].mxu0  ;;  %v2453_v12 = vpop.f32.mrb[9].mxu1  ;;  %v1491_v13 = vadd.f32 %v1490_v59, %v2444_v62  ;;  %v951_v0 = vadd.s32 112, %v2303_v36  ;;  %vm3080_vm10 = vcmp.lt.s32.totalorder %v2483_v38, 640 }
 0x110   : > { %v542_v15 = vadd.f32 %v541_v11, %v2328_v47  ;;  %v543_v16 = vpop.f32.mrb[10].mxu0  ;;  %v2466_v20 = vpop.f32.mrb[10].mxu1  ;;  %v964_v11 = vadd.s32 216, %v2303_v36  ;;  %v2534_v35 = vadd.s32 %v2315_v42, %v952_v2  ;;  %v965_v2 = vadd.s32 224, %v2303_v36 }
 0x111   : > { %v851_v21 = vmax.f32 %v540_v8, 0.0  ;;  %v544_v23 = vadd.f32 %v543_v16, %v2325_v46  ;;  %v545_v24 = vpop.f32.mrb[11].mxu0  ;;  %v2470_v26 = vpop.f32.mrb[11].mxu1 }
 0x112   : > { %v852_v27 = vmax.f32 %v542_v15, 0.0  ;;  %v546_v29 = vadd.f32 %v545_v24, %v2328_v47  ;;  %v3098_v24 = vmov 0 }
 0x113   : > { %v1110_v39 = vsel %vm3050_vm15, %v851_v21, 0.0  ;;  %v854_v41 = vmax.f32 %v544_v23, 0.0 }
 0x114   : > { %v1455_v50 = vadd.f32 %v1454_v61, %v1110_v39  ;;  %v2490_v54 = vsel %vm3050_vm15, %v852_v27, 0.0  ;;  %v855_v58 = vmax.f32 %v546_v29, 0.0  ;;  %vm3061_vm15 = vcmp.lt.s32.totalorder %v2477_v31, 640 }
 0x115   : > { %v1113_v59 = vsel %vm3051_vm0, %v854_v41, 0.0  ;;  %v1492_v4 = vadd.f32 %v1491_v13, %v2490_v54  ;;  %v271_v13 = vsub.s32 2, %v2303_v36  ;;  %v2522_v27 = vadd.s32 %v2315_v42, %v963_v43 }
 0x116   : > { %v1456_v5 = vadd.f32 %v1455_v50, %v1113_v59  ;;  %v2499_v7 = vsel %vm3051_vm0, %v855_v58, 0.0  ;;  %v549_v61 = vpop.f32.mrb[12].mxu0  ;;  %v2501_v8 = vpop.f32.mrb[12].mxu1  ;;  %vm2515_vm0 = vmpackc.low %vm3061_vm15, %vm1014_vm1  ;;  %v642_v43 = vadd.f32 %v2344_v56, %v2328_v47  ;;  %vm1017_vm15 = vcmp.lt.s32.totalorder %v2534_v35, 640 }
 0x117   : > { %v550_v15 = vadd.f32 %v549_v61, %v2325_v46  ;;  %v551_v16 = vpop.f32.mrb[13].mxu0  ;;  %v2507_v21 = vpop.f32.mrb[13].mxu1  ;;  %v1493_v23 = vadd.f32 %v1492_v4, %v2499_v7  ;;  %v3099_v24 = vsel %vm2515_vm0, 4294967295, %v3098_v24  ;;  %v2531_v61 = vadd.s32 %v2315_v42, %v951_v0 }
 0x118   : > { %3100 = vst [vmem:[#allocation15_spill] sm:$0xff] %v3099_v24  ;;  %v552_v29 = vadd.f32 %v551_v16, %v2328_v47  ;;  %v553_v39 = vpop.f32.mrb[14].mxu0  ;;  %v2525_v41 = vpop.f32.mrb[14].mxu1  ;;  %v646_v16 = vadd.f32 %v2364_v3, %v2328_v47  ;;  %v2547_v25 = vrot.slane %v2312_v40, %v271_v13  ;;  %vm3081_vm6 = vcmp.lt.s32.totalorder %v2522_v27, 640 }
 0x119   : > { %v857_v50 = vmax.f32 %v550_v15, 0.0  ;;  %v554_v58 = vadd.f32 %v553_v39, %v2325_v46  ;;  %v555_v59 = vpop.f32.mrb[15].mxu0  ;;  %v2528_v4 = vpop.f32.mrb[15].mxu1  ;;  %v2542_v39 = vadd.s32 %v2315_v42, %v964_v11  ;;  %vm1016_vm5 = vcmp.lt.s32.totalorder %v2531_v61, 640 }
 0x11a   : > { %v858_v24 = vmax.f32 %v552_v29, 0.0  ;;  %v556_v15 = vadd.f32 %v555_v59, %v2328_v47  ;;  %v912_v13 = vmax.f32 %v642_v43, 0.0  ;;  %v915_v29 = vmax.f32 %v646_v16, 0.0 }
 0x11b   : > { %v1116_v14 = vsel %vm1008_vm2, %v857_v50, 0.0  ;;  %v860_v0 = vmax.f32 %v554_v58, 0.0  ;;  %v967_v43 = vadd.s32 240, %v2303_v36 }
 0x11c   : > { %v1457_v57 = vadd.f32 %v1456_v5, %v1116_v14  ;;  %v2552_v56 = vsel %vm1008_vm2, %v858_v24, 0.0  ;;  %v861_v3 = vmax.f32 %v556_v15, 0.0  ;;  %v652_v24 = vadd.f32 %v2396_v22, %v2328_v47  ;;  %vm2573_vm2 = vmpackc.low %vm1017_vm15, %vm1016_vm5 }
 0x11d   : > { %v1119_v11 = vsel %vm1009_vm3, %v860_v0, 0.0  ;;  %v1494_v40 = vadd.f32 %v1493_v23, %v2552_v56  ;;  %v3102_v45 = vsel %vm2573_vm2, 4294967295, %v3101_v45  ;;  %v966_v22 = vadd.s32 232, %v2303_v36 }
 0x11e   : > { %v1458_v50 = vadd.f32 %v1457_v57, %v1119_v11  ;;  %v2562_v44 = vsel %vm1009_vm3, %v861_v3, 0.0  ;;  %v559_v14 = vpop.f32.mrb[16].mxu0  ;;  %v712_v5 = vpop.f32.mrb[16].mxu1  ;;  %3103 = vst [vmem:[#allocation16_spill] sm:$0xff] %v3102_v45  ;;  %v2578_v57 = vadd.s32 %v2315_v42, %v965_v2  ;;  %v2588_v10 = vsel %vm3082_vm11, %v912_v13, 0.0 }
 0x11f   : > { %v560_v58 = vadd.f32 %v559_v14, %v2325_v46  ;;  %v713_v59 = vadd.f32 %v712_v5, %v2547_v25  ;;  %v561_v15 = vpop.f32.mrb[17].mxu0  ;;  %v714_v0 = vpop.f32.mrb[17].mxu1  ;;  %v1495_v23 = vadd.f32 %v1494_v40, %v2562_v44  ;;  %v918_v9 = vmax.f32 %v652_v24, 0.0 }
 0x120   : > { %v562_v16 = vadd.f32 %v561_v15, %v2328_v47  ;;  %v563_v3 = vpop.f32.mrb[18].mxu0  ;;  %v715_v11 = vpop.f32.mrb[18].mxu1  ;;  %v2592_v15 = vsel %vm3080_vm10, %v915_v29, 0.0  ;;  %vm1029_vm3 = vcmp.lt.s32.totalorder %v2542_v39, 640  ;;  %v2624_v6 = vadd.s32 %v2315_v42, %v967_v43 }
 0x121   : > { %v863_v40 = vmax.f32 %v560_v58, 0.0  ;;  %v841_v14 = vmax.f32 %v713_v59, 0.0  ;;  %v564_v5 = vadd.f32 %v563_v3, %v2325_v46  ;;  %v716_v0 = vadd.f32 %v715_v11, %v2547_v25  ;;  %v565_v55 = vpop.f32.mrb[19].mxu0  ;;  %v717_v48 = vpop.f32.mrb[19].mxu1 }
 0x122   : > { %v864_v45 = vmax.f32 %v562_v16, 0.0  ;;  %v566_v2 = vadd.f32 %v565_v55, %v2328_v47  ;;  %v656_v48 = vadd.f32 %v2415_v33, %v2328_v47  ;;  %v2611_v33 = vadd.s32 %v2315_v42, %v966_v22 }
 0x123   : > { %v1122_v58 = vsel %vm1010_vm7, %v863_v40, 0.0  ;;  %v866_v59 = vmax.f32 %v564_v5, 0.0  ;;  %v844_v3 = vmax.f32 %v716_v0, 0.0  ;;  %v662_v43 = vadd.f32 %v2453_v12, %v2328_v47 }
 0x124   : > { %v1459_v16 = vadd.f32 %v1458_v50, %v1122_v58  ;;  %v2600_v55 = vsel %vm1010_vm7, %v864_v45, 0.0  ;;  %v867_v13 = vmax.f32 %v566_v2, 0.0  ;;  %vm1030_vm7 = vcmp.lt.s32.totalorder %v2578_v57, 640 }
 0x125   : > { %v1125_v11 = vsel %vm1011_vm8, %v866_v59, 0.0  ;;  %v2604_v29 = vpack.c.bf16 %v844_v3, %v841_v14  ;;  %v1496_v24 = vadd.f32 %v1495_v23, %v2600_v55  ;;  %v921_v59 = vmax.f32 %v656_v48, 0.0 }
 0x126   : > { %v1460_v50 = vadd.f32 %v1459_v16, %v1125_v11  ;;  %v2615_v63 = vsel %vm1011_vm8, %v867_v13, 0.0  ;;  %v569_v45 = vpop.f32.mrb[20].mxu0  ;;  %v720_v5 = vpop.f32.mrb[20].mxu1  ;;  %v2629_v11 = vsel %vm3081_vm6, %v918_v9, 0.0  ;;  %v666_v48 = vadd.f32 %v2470_v26, %v2328_v47 }
 0x127   : > { %3104 = vst [vmem:[#allocation17_spill] sm:$0xff] %v2604_v29  ;;  %3105 = vst [vmem:[#allocation18_spill] sm:$0xff] %v2615_v63  ;;  %v570_v14 = vadd.f32 %v569_v45, %v2325_v46  ;;  %v721_v23 = vadd.f32 %v720_v5, %v2547_v25  ;;  %v571_v0 = vpop.f32.mrb[21].mxu0  ;;  %v722_v2 = vpop.f32.mrb[21].mxu1  ;;  %v1497_v58 = vadd.f32 %v1496_v24, %v2615_v63  ;;  %v968_v9 = vadd.s32 248, %v2303_v36 }
 0x128   : > { %v572_v3 = vadd.f32 %v571_v0, %v2328_v47  ;;  %v573_v16 = vpop.f32.mrb[22].mxu0  ;;  %v723_v13 = vpop.f32.mrb[22].mxu1  ;;  %v2647_v12 = vsel %vm1029_vm3, %v921_v59, 0.0  ;;  %vm3069_vm8 = vcmp.lt.s32.totalorder %v2611_v33, 640 }
 0x129   : > { %v869_v45 = vmax.f32 %v570_v14, 0.0  ;;  %v847_v5 = vmax.f32 %v721_v23, 0.0  ;;  %v574_v2 = vadd.f32 %v573_v16, %v2325_v46  ;;  %v724_v24 = vadd.f32 %v723_v13, %v2547_v25  ;;  %v575_v40 = vpop.f32.mrb[23].mxu0  ;;  %v725_v22 = vpop.f32.mrb[23].mxu1 }
 0x12a   : > { %v870_v0 = vmax.f32 %v572_v3, 0.0  ;;  %v576_v63 = vadd.f32 %v575_v40, %v2328_v47  ;;  %v2668_v37 = vadd.s32 %v2315_v42, %v968_v9 }
 0x12b   : > { %v1128_v14 = vsel %vm1012_vm12, %v869_v45, 0.0  ;;  %v872_v23 = vmax.f32 %v574_v2, 0.0  ;;  %v850_v16 = vmax.f32 %v724_v24, 0.0  ;;  %v927_v2 = vmax.f32 %v666_v48, 0.0 }
 0x12c   : > { %v1461_v29 = vadd.f32 %v1460_v50, %v1128_v14  ;;  %v2643_v22 = vsel %vm1012_vm12, %v870_v0, 0.0  ;;  %v873_v13 = vmax.f32 %v576_v63, 0.0  ;;  %v924_v50 = vmax.f32 %v662_v43, 0.0 }
 0x12d   : > { %v1131_v26 = vsel %vm1013_vm13, %v872_v23, 0.0  ;;  %v2651_v40 = vpack.c.bf16 %v850_v16, %v847_v5  ;;  %v1498_v3 = vadd.f32 %v1497_v58, %v2643_v22  ;;  %vm3084_vm12 = vcmp.lt.s32.totalorder %v2624_v6, 640 }
 0x12e   : > { %v1462_v34 = vadd.f32 %v1461_v29, %v1131_v26  ;;  %v2658_v63 = vsel %vm1013_vm13, %v873_v13, 0.0  ;;  %v579_v24 = vpop.f32.mrb[24].mxu0  ;;  %v728_v59 = vpop.f32.mrb[24].mxu1  ;;  %v672_v16 = vadd.f32 %v2507_v21, %v2328_v47  ;;  %v2678_v9 = vsel %vm1030_vm7, %v924_v50, 0.0 }
 0x12f   : > { %3106 = vst [vmem:[#allocation19_spill] sm:$0xff] %v2651_v40  ;;  %3107 = vst [vmem:[#allocation20_spill] sm:$0xff] %v2658_v63  ;;  %v580_v0 = vadd.f32 %v579_v24, %v2325_v46  ;;  %v729_v14 = vadd.f32 %v728_v59, %v2547_v25  ;;  %v581_v5 = vpop.f32.mrb[25].mxu0  ;;  %v730_v23 = vpop.f32.mrb[25].mxu1  ;;  %v1499_v58 = vadd.f32 %v1498_v3, %v2658_v63  ;;  %vm3109_vm13 = vcmp.lt.s32.totalorder %v2477_v31, 640 }
 0x130   : > { %v582_v29 = vadd.f32 %v581_v5, %v2328_v47  ;;  %v583_v43 = vpop.f32.mrb[26].mxu0  ;;  %v731_v48 = vpop.f32.mrb[26].mxu1 }
 0x131   : > { %v875_v13 = vmax.f32 %v580_v0, 0.0  ;;  %v853_v26 = vmax.f32 %v729_v14, 0.0  ;;  %v584_v24 = vadd.f32 %v583_v43, %v2325_v46  ;;  %v732_v3 = vadd.f32 %v731_v48, %v2547_v25  ;;  %v585_v59 = vpop.f32.mrb[27].mxu0  ;;  %v733_v23 = vpop.f32.mrb[27].mxu1 }
 0x132   : > { %v876_v45 = vmax.f32 %v582_v29, 0.0  ;;  %v586_v63 = vadd.f32 %v585_v59, %v2328_v47  ;;  %v2684_v43 = vsel %vm3069_vm8, %v927_v2, 0.0  ;;  %v676_v48 = vadd.f32 %v2528_v4, %v2328_v47  ;;  %vm3111_vm8 = vmmov %vm3109_vm13 }
 0x133   : > { %v1134_v0 = vsel %vm1014_vm1, %v875_v13, 0.0  ;;  %v878_v14 = vmax.f32 %v584_v24, 0.0  ;;  %v856_v5 = vmax.f32 %v732_v3, 0.0  ;;  %v930_v24 = vmax.f32 %v672_v16, 0.0 }
 0x134   : > { %v1463_v21 = vadd.f32 %v1462_v34, %v1134_v0  ;;  %v2690_v29 = vsel %vm1014_vm1, %v876_v45, 0.0  ;;  %v879_v59 = vmax.f32 %v586_v63, 0.0  ;;  %v953_v34 = vadd.s32 128, %v2303_v36 }
 0x135   : > { %3108 = vst [vmem:[#allocation21_spill] sm:$0xff] %v2690_v29  ;;  %v1137_v50 = vsel %vm3109_vm13, %v878_v14, 0.0  ;;  %v2694_v23 = vpack.c.bf16 %v856_v5, %v853_v26  ;;  %v1500_v13 = vadd.f32 %v1499_v58, %v2690_v29  ;;  %vm3076_vm1 = vcmp.lt.s32.totalorder %v2668_v37, 640 }
 0x136   : > { %v1464_v3 = vadd.f32 %v1463_v21, %v1137_v50  ;;  %v2701_v4 = vsel %vm3111_vm8, %v879_v59, 0.0  ;;  %v589_v30 = vpop.f32.mrb[28].mxu0  ;;  %v736_v45 = vpop.f32.mrb[28].mxu1  ;;  %v933_v31 = vmax.f32 %v676_v48, 0.0  ;;  %v954_v16 = vadd.s32 136, %v2303_v36 }
 0x137   : > { %3110 = vst [vmem:[#allocation22_spill] sm:$0xff] %v2694_v23  ;;  %3112 = vst [vmem:[#allocation23_spill] sm:$0xff] %v2701_v4  ;;  %v590_v63 = vadd.f32 %v589_v30, %v2325_v46  ;;  %v737_v26 = vadd.f32 %v736_v45, %v2547_v25  ;;  %v591_v0 = vpop.f32.mrb[29].mxu0  ;;  %v738_v14 = vpop.f32.mrb[29].mxu1  ;;  %v1501_v58 = vadd.f32 %v1500_v13, %v2701_v4  ;;  %v2717_v48 = vsel %vm3084_vm12, %v930_v24, 0.0 }
 0x138   : > { %v592_v5 = vadd.f32 %v591_v0, %v2328_v47  ;;  %v593_v21 = vpop.f32.mrb[30].mxu0  ;;  %v739_v59 = vpop.f32.mrb[30].mxu1 }
 0x139   : > { %v881_v50 = vmax.f32 %v590_v63, 0.0  ;;  %v859_v2 = vmax.f32 %v737_v26, 0.0  ;;  %v594_v30 = vadd.f32 %v593_v21, %v2325_v46  ;;  %v740_v45 = vadd.f32 %v739_v59, %v2547_v25  ;;  %v595_v23 = vpop.f32.mrb[31].mxu0  ;;  %v741_v14 = vpop.f32.mrb[31].mxu1 }
 0x13a   : > { %v882_v29 = vmax.f32 %v592_v5, 0.0  ;;  %v596_v13 = vadd.f32 %v595_v23, %v2328_v47  ;;  %v2722_v21 = vadd.s32 %v2315_v42, %v953_v34  ;;  %v2730_v14 = vsel %vm3076_vm1, %v933_v31, 0.0 }
 0x13b   : > { %v1140_v0 = vsel %vm1016_vm5, %v881_v50, 0.0  ;;  %v884_v63 = vmax.f32 %v594_v30, 0.0  ;;  %v862_v26 = vmax.f32 %v740_v45, 0.0  ;;  %3114 = vst [vmem:[#allocation25_spill] sm:$0xff] %v2730_v14  ;;  %v2744_v31 = vadd.s32 %v2315_v42, %v954_v16 }
 0x13c   : > { %v1465_v59 = vadd.f32 %v1464_v3, %v1140_v0  ;;  %v2726_v5 = vsel %vm1016_vm5, %v882_v29, 0.0  ;;  %v885_v23 = vmax.f32 %v596_v13, 0.0  ;;  %vm1018_vm5 = vcmp.lt.s32.totalorder %v2722_v21, 640 }
 0x13d   : > { %3113 = vst [vmem:[#allocation24_spill] sm:$0xff] %v2726_v5  ;;  %v1143_v24 = vsel %vm1017_vm15, %v884_v63, 0.0  ;;  %v2734_v4 = vpack.c.bf16 %v862_v26, %v859_v2  ;;  %v1502_v50 = vadd.f32 %v1501_v58, %v2726_v5  ;;  %v955_v16 = vadd.s32 144, %v2303_v36 }
 0x13e   : > { %v1466_v3 = vadd.f32 %v1465_v59, %v1143_v24  ;;  %v2741_v61 = vsel %vm1017_vm15, %v885_v23, 0.0  ;;  %v599_v29 = vpop.f32.mrb[32].mxu0  ;;  %v744_v30 = vpop.f32.mrb[32].mxu1  ;;  %vm1019_vm15 = vcmp.lt.s32.totalorder %v2744_v31, 640 }
 0x13f   : > { %3115 = vst [vmem:[#allocation26_spill] sm:$0xff] %v2734_v4  ;;  %3116 = vst [vmem:[#allocation27_spill] sm:$0xff] %v2741_v61  ;;  %v600_v45 = vadd.f32 %v599_v29, %v2325_v46  ;;  %v745_v2 = vadd.f32 %v744_v30, %v2547_v25  ;;  %v601_v13 = vpop.f32.mrb[33].mxu0  ;;  %v746_v0 = vpop.f32.mrb[33].mxu1  ;;  %v1503_v58 = vadd.f32 %v1502_v50, %v2741_v61  ;;  %v956_v61 = vadd.s32 152, %v2303_v36 }
 0x140   : > { %v602_v35 = vadd.f32 %v601_v13, %v2328_v47  ;;  %v603_v26 = vpop.f32.mrb[34].mxu0  ;;  %v747_v59 = vpop.f32.mrb[34].mxu1 }
 0x141   : > { %v887_v23 = vmax.f32 %v600_v45, 0.0  ;;  %v865_v24 = vmax.f32 %v745_v2, 0.0  ;;  %v604_v29 = vadd.f32 %v603_v26, %v2325_v46  ;;  %v748_v30 = vadd.f32 %v747_v59, %v2547_v25  ;;  %v605_v0 = vpop.f32.mrb[35].mxu0  ;;  %v749_v34 = vpop.f32.mrb[35].mxu1 }
 0x142   : > { %v888_v50 = vmax.f32 %v602_v35, 0.0  ;;  %v606_v63 = vadd.f32 %v605_v0, %v2328_v47  ;;  %v2762_v26 = vadd.s32 %v2315_v42, %v955_v16 }
 0x143   : > { %v1146_v13 = vsel %vm1018_vm5, %v887_v23, 0.0  ;;  %v890_v4 = vmax.f32 %v604_v29, 0.0  ;;  %v868_v5 = vmax.f32 %v748_v30, 0.0 }
 0x144   : > { %v1467_v45 = vadd.f32 %v1466_v3, %v1146_v13  ;;  %v891_v2 = vmax.f32 %v606_v63, 0.0  ;;  %v1147_v34 = vsel %vm1018_vm5, %v888_v50, 0.0  ;;  %v2772_v3 = vadd.s32 %v2315_v42, %v956_v61 }
 0x145   : > { %v1149_v35 = vsel %vm1019_vm15, %v890_v4, 0.0  ;;  %v2768_v59 = vpack.c.bf16 %v868_v5, %v865_v24  ;;  %v1893_v0 = vpack.i.bf16 %v2389_v18, %v1147_v34  ;;  %v1504_v40 = vadd.f32 %v1503_v58, %v1147_v34 }
 0x146   : > { %v1468_v14 = vadd.f32 %v1467_v45, %v1149_v35  ;;  %v609_v23 = vpop.f32.mrb[36].mxu0  ;;  %v752_v29 = vpop.f32.mrb[36].mxu1  ;;  %v1150_v63 = vsel %vm1019_vm15, %v891_v2, 0.0  ;;  %vm3079_vm8 = vcmp.lt.s32.totalorder %v2762_v26, 640  ;;  %v957_v13 = vadd.s32 160, %v2303_v36 }
 0x147   : > { %3117 = vst [vmem:[#allocation28_spill] sm:$0xff] %v2768_v59  ;;  %v610_v16 = vadd.f32 %v609_v23, %v2325_v46  ;;  %v753_v30 = vadd.f32 %v752_v29, %v2547_v25  ;;  %v611_v50 = vpop.f32.mrb[37].mxu0  ;;  %v754_v4 = vpop.f32.mrb[37].mxu1  ;;  %1894 = vxpose.xlu0.b32.start [1/16] %v1893_v0, 128  ;;  %v1895_v5 = vpack.i.bf16 %v2393_v19, %v1150_v63  ;;  %vm3077_vm13 = vcmp.lt.s32.totalorder %v2772_v3, 640 }
 0x148   : > { %v1505_v18 = vadd.f32 %v1504_v40, %v1150_v63  ;;  %v612_v58 = vadd.f32 %v611_v50, %v2328_v47  ;;  %v613_v24 = vpop.f32.mrb[38].mxu0  ;;  %v755_v61 = vpop.f32.mrb[38].mxu1  ;;  %v958_v40 = vadd.s32 168, %v2303_v36 }
 0x149   : > { %v893_v45 = vmax.f32 %v610_v16, 0.0  ;;  %v871_v2 = vmax.f32 %v753_v30, 0.0  ;;  %v614_v34 = vadd.f32 %v613_v24, %v2325_v46  ;;  %v756_v35 = vadd.f32 %v755_v61, %v2547_v25  ;;  %v615_v23 = vpop.f32.mrb[39].mxu0  ;;  %v757_v29 = vpop.f32.mrb[39].mxu1 }
 0x14a   : > { %v894_v0 = vmax.f32 %v612_v58, 0.0  ;;  %v616_v19 = vadd.f32 %v615_v23, %v2328_v47  ;;  %v2790_v24 = vadd.s32 %v2315_v42, %v957_v13  ;;  %v959_v13 = vadd.s32 176, %v2303_v36 }
 0x14b   : > { %v1152_v63 = vsel %vm3079_vm8, %v893_v45, 0.0  ;;  %v896_v50 = vmax.f32 %v614_v34, 0.0  ;;  %v874_v4 = vmax.f32 %v756_v35, 0.0  ;;  %1896 = vxpose.xlu0.b32.cont [2/16] %v1895_v5, 128 }
 0x14c   : > { %v1469_v16 = vadd.f32 %v1468_v14, %v1152_v63  ;;  %v897_v30 = vmax.f32 %v616_v19, 0.0  ;;  %v1153_v58 = vsel %vm3079_vm8, %v894_v0, 0.0  ;;  %v2800_v14 = vadd.s32 %v2315_v42, %v958_v40 }
 0x14d   : > { %v1155_v61 = vsel %vm3077_vm13, %v896_v50, 0.0  ;;  %v2796_v23 = vpack.c.bf16 %v874_v4, %v871_v2  ;;  %v1897_v29 = vpack.i.bf16 %v2432_v53, %v1153_v58  ;;  %v1506_v59 = vadd.f32 %v1505_v18, %v1153_v58 }
 0x14e   : > { %v1470_v45 = vadd.f32 %v1469_v16, %v1155_v61  ;;  %v619_v34 = vpop.f32.mrb[40].mxu0  ;;  %v760_v35 = vpop.f32.mrb[40].mxu1  ;;  %v1156_v5 = vsel %vm3077_vm13, %v897_v30, 0.0  ;;  %vm3078_vm1 = vcmp.lt.s32.totalorder %v2790_v24, 640  ;;  %v960_v16 = vadd.s32 184, %v2303_v36 }
 0x14f   : > { %v620_v0 = vadd.f32 %v619_v34, %v2325_v46  ;;  %v761_v19 = vadd.f32 %v760_v35, %v2547_v25  ;;  %v621_v2 = vpop.f32.mrb[41].mxu0  ;;  %v762_v63 = vpop.f32.mrb[41].mxu1  ;;  %1898 = vxpose.xlu0.b32.cont [3/16] %v1897_v29, 128  ;;  %v1899_v53 = vpack.i.bf16 %v2444_v62, %v1156_v5  ;;  %v1507_v18 = vadd.f32 %v1506_v59, %v1156_v5 }
 0x150   : > { %v622_v40 = vadd.f32 %v621_v2, %v2328_v47  ;;  %v623_v50 = vpop.f32.mrb[42].mxu0  ;;  %v763_v4 = vpop.f32.mrb[42].mxu1  ;;  %vm1023_vm13 = vcmp.lt.s32.totalorder %v2800_v14, 640 }
 0x151   : > { %v899_v30 = vmax.f32 %v620_v0, 0.0  ;;  %v877_v58 = vmax.f32 %v761_v19, 0.0  ;;  %v624_v61 = vadd.f32 %v623_v50, %v2325_v46  ;;  %v764_v34 = vadd.f32 %v763_v4, %v2547_v25  ;;  %v625_v35 = vpop.f32.mrb[43].mxu0  ;;  %v765_v63 = vpop.f32.mrb[43].mxu1 }
 0x152   : > { %v900_v29 = vmax.f32 %v622_v40, 0.0  ;;  %v626_v62 = vadd.f32 %v625_v35, %v2328_v47  ;;  %v2818_v0 = vadd.s32 %v2315_v42, %v959_v13  ;;  %v2823_v40 = vadd.s32 %v2315_v42, %v960_v16 }
 0x153   : > { %v1158_v59 = vsel %vm3078_vm1, %v899_v30, 0.0  ;;  %v902_v5 = vmax.f32 %v624_v61, 0.0  ;;  %v880_v2 = vmax.f32 %v764_v34, 0.0  ;;  %1900 = vxpose.xlu0.b32.cont [4/16] %v1899_v53, 128  ;;  %v640_v13 = vadd.f32 %v2335_v51, %v2325_v46 }
 0x154   : > { %v1471_v19 = vadd.f32 %v1470_v45, %v1158_v59  ;;  %v903_v50 = vmax.f32 %v626_v62, 0.0  ;;  %v1159_v4 = vsel %vm3078_vm1, %v900_v29, 0.0  ;;  %v644_v45 = vadd.f32 %v2355_v60, %v2325_v46 }
 0x155   : > { %v1161_v35 = vsel %vm1023_vm13, %v902_v5, 0.0  ;;  %v2827_v63 = vpack.c.bf16 %v880_v2, %v877_v58  ;;  %v1901_v30 = vpack.i.bf16 %v2490_v54, %v1159_v4  ;;  %v1508_v61 = vadd.f32 %v1507_v18, %v1159_v4 }
 0x156   : > { %v1472_v53 = vadd.f32 %v1471_v19, %v1161_v35  ;;  %v629_v34 = vpop.f32.mrb[44].mxu0  ;;  %v768_v29 = vpop.f32.mrb[44].mxu1  ;;  %v1162_v42 = vsel %vm1023_vm13, %v903_v50, 0.0  ;;  %vm1024_vm1 = vcmp.lt.s32.totalorder %v2818_v0, 640  ;;  %vm3083_vm8 = vcmp.lt.s32.totalorder %v2823_v40, 640 }
 0x157   : > { %v630_v16 = vadd.f32 %v629_v34, %v2325_v46  ;;  %v769_v58 = vadd.f32 %v768_v29, %v2547_v25  ;;  %v631_v62 = vpop.f32.mrb[45].mxu0  ;;  %v770_v59 = vpop.f32.mrb[45].mxu1  ;;  %1902 = vxpose.xlu0.b32.cont [5/16] %v1901_v30, 128  ;;  %v1903_v54 = vpack.i.bf16 %v2499_v7, %v1162_v42  ;;  %v1509_v18 = vadd.f32 %v1508_v61, %v1162_v42  ;;  %v1451_v0 = vld [vmem:[#allocation4] sm:$0x3] }
 0x158   : > { %v632_v51 = vadd.f32 %v631_v62, %v2328_v47  ;;  %v633_v60 = vpop.f32.mrb[46].mxu0  ;;  %v771_v5 = vpop.f32.mrb[46].mxu1  ;;  %v911_v30 = vmax.f32 %v640_v13, 0.0  ;;  %v650_v7 = vadd.f32 %v2384_v17, %v2325_v46  ;;  %v914_v42 = vmax.f32 %v644_v45, 0.0 }
 0x159   : > { %v905_v2 = vmax.f32 %v630_v16, 0.0  ;;  %v883_v19 = vmax.f32 %v769_v58, 0.0  ;;  %v634_v50 = vadd.f32 %v633_v60, %v2325_v46  ;;  %v772_v4 = vadd.f32 %v771_v5, %v2547_v25  ;;  %v635_v35 = vpop.f32.mrb[47].mxu0  ;;  %v773_v34 = vpop.f32.mrb[47].mxu1 }
 0x15a   : > { %v906_v61 = vmax.f32 %v632_v51, 0.0  ;;  %v636_v29 = vadd.f32 %v635_v35, %v2328_v47  ;;  %v654_v58 = vadd.f32 %v2411_v28, %v2325_v46 }
 0x15b   : > { %v1164_v62 = vsel %vm1024_vm1, %v905_v2, 0.0  ;;  %v908_v59 = vmax.f32 %v634_v50, 0.0  ;;  %v886_v16 = vmax.f32 %v772_v4, 0.0  ;;  %1904 = vxpose.xlu0.b32.cont [6/16] %v1903_v54, 128  ;;  %v1170_v2 = vsel %vm3082_vm11, %v911_v30, 0.0 }
 0x15c   : > { %v1473_v60 = vadd.f32 %v1472_v53, %v1164_v62  ;;  %v909_v5 = vmax.f32 %v636_v29, 0.0  ;;  %v1165_v13 = vsel %vm1024_vm1, %v906_v61, 0.0  ;;  %v917_v54 = vmax.f32 %v650_v7, 0.0 }
 0x15d   : > { %v1167_v17 = vsel %vm3083_vm8, %v908_v59, 0.0  ;;  %v2855_v51 = vpack.c.bf16 %v886_v16, %v883_v19  ;;  %v1905_v47 = vpack.i.bf16 %v2552_v56, %v1165_v13  ;;  %v1510_v45 = vadd.f32 %v1509_v18, %v1165_v13 }
 0x15e   : > { %v1474_v50 = vadd.f32 %v1473_v60, %v1167_v17  ;;  %v776_v4 = vpop.f32.mrb[48].mxu1  ;;  %v1168_v28 = vsel %vm3083_vm8, %v909_v5, 0.0  ;;  %v660_v53 = vadd.f32 %v2446_v1, %v2325_v46  ;;  %v1173_v18 = vsel %vm3080_vm10, %v914_v42, 0.0  ;;  %vm1811_vm10 = vmpackc.low %vm1019_vm15, %vm1018_vm5 }
 0x15f   : > { %v777_v35 = vadd.f32 %v776_v4, %v2547_v25  ;;  %v778_v34 = vpop.f32.mrb[49].mxu1  ;;  %1906 = vxpose.xlu0.b32.cont [7/16] %v1905_v47, 128  ;;  %v1907_v19 = vpack.i.bf16 %v2562_v44, %v1168_v28  ;;  %v1511_v56 = vadd.f32 %v1510_v45, %v1168_v28  ;;  %v664_v30 = vadd.f32 %v2466_v20, %v2325_v46 }
 0x160   : > { %v1475_v7 = vadd.f32 %v1474_v50, %v1170_v2  ;;  %v779_v61 = vpop.f32.mrb[50].mxu1  ;;  %v920_v29 = vmax.f32 %v654_v58, 0.0  ;;  %v1176_v60 = vsel %vm3081_vm6, %v917_v54, 0.0  ;;  %v923_v5 = vmax.f32 %v660_v53, 0.0 }
 0x161   : > { %v889_v62 = vmax.f32 %v777_v35, 0.0  ;;  %v780_v59 = vadd.f32 %v779_v61, %v2547_v25  ;;  %v781_v1 = vpop.f32.mrb[51].mxu1  ;;  %v1512_v16 = vadd.f32 %v1511_v56, %v2588_v10  ;;  %v670_v42 = vadd.f32 %v2501_v8, %v2325_v46  ;;  %v3122_v35 = vld [vmem:[#allocation17_spill] sm:$0xff]  ;;  %v3123_v61 = vld [vmem:[#allocation18_spill] sm:$0xff] }
 0x162   : > { %v1476_v44 = vadd.f32 %v1475_v7, %v1173_v18  ;;  %v926_v17 = vmax.f32 %v664_v30, 0.0  ;;  %v1179_v47 = vsel %vm1029_vm3, %v920_v29, 0.0  ;;  %v674_v45 = vadd.f32 %v2525_v41, %v2325_v46 }
 0x163   : > { %v892_v13 = vmax.f32 %v780_v59, 0.0  ;;  %1908 = vxpose.xlu0.b32.cont [8/16] %v1907_v19, 128  ;;  %v1513_v20 = vadd.f32 %v1512_v16, %v2592_v15  ;;  %vm3118_vm6 = vcmp.lt.s32.totalorder %v2333_v49, 640  ;;  %vm3119_vm11 = vcmp.lt.s32.totalorder %v2338_v52, 640 }
 0x164   : > { %v1477_v58 = vadd.f32 %v1476_v44, %v1176_v60  ;;  %vm1814_vm8 = vmpackc.low %vm3119_vm11, %vm3118_vm6  ;;  %v1182_v21 = vsel %vm1030_vm7, %v923_v5, 0.0  ;;  %v929_v31 = vmax.f32 %v670_v42, 0.0  ;;  %v3120_v46 = vpack.i.bf16 %v2600_v55, %v2588_v10  ;;  %v3128_v60 = vld [vmem:[#allocation9_spill] sm:$0xff]  ;;  %v3130_v44 = vld [vmem:[#allocation10_spill] sm:$0xff] }
 0x165   : > { %v1810_v2 = vpack.c.bf16 %v892_v13, %v889_v62  ;;  %v1514_v8 = vadd.f32 %v1513_v20, %v2629_v11  ;;  %vm3121_vm6 = vcmp.lt.s32.totalorder %v2611_v33, 640  ;;  %v932_v34 = vmax.f32 %v674_v45, 0.0 }
 0x166   : > { %v1478_v54 = vadd.f32 %v1477_v58, %v1179_v47  ;;  %v784_v50 = vpop.f32.mrb[52].mxu1  ;;  %v1185_v52 = vsel %vm3121_vm6, %v926_v17, 0.0  ;;  %v1188_v10 = vsel %vm3084_vm12, %v929_v31, 0.0  ;;  %v3124_v29 = vpack.i.bf16 %v3123_v61, %v2592_v15  ;;  %v3134_v47 = vld [vmem:[#allocation19_spill] sm:$0xff] }
 0x167   : > { %v785_v4 = vadd.f32 %v784_v50, %v2547_v25  ;;  %v786_v28 = vpop.f32.mrb[53].mxu1  ;;  %1812 = vmatprep.subr.msk.bf16.mxu0 %vm1811_vm10, %v1810_v2  ;;  %1910 = vxpose.xlu0.b32.cont [9/16] %v3120_v46, 128  ;;  %v1515_v49 = vadd.f32 %v1514_v8, %v2647_v12  ;;  %vm3125_vm10 = vcmp.lt.s32.totalorder %v2762_v26, 640  ;;  %vm3126_vm11 = vcmp.lt.s32.totalorder %v2772_v3, 640  ;;  %v3133_v3 = vld [vmem:[#allocation25_spill] sm:$0xff] }
 0x168   : > { %v1479_v41 = vadd.f32 %v1478_v54, %v1182_v21  ;;  %v787_v53 = vpop.f32.mrb[54].mxu1  ;;  %1815 = vmatpush3.bf16.msk.msra.mxu0 %vm1814_vm8, %v3122_v35  ;;  %vm1817_vm5 = vmpackc.low %vm3126_vm11, %vm3125_vm10  ;;  %vm3127_vm15 = vcmp.lt.s32.totalorder %v2668_v37, 640  ;;  %vm3129_vm8 = vcmp.lt.s32.totalorder %v3128_v60, 640  ;;  %vm3131_vm6 = vcmp.lt.s32.totalorder %v3130_v44, 640  ;;  %v3145_v60 = vld [vmem:[#allocation23_spill] sm:$0xff] }
 0x169   : > { %v895_v19 = vmax.f32 %v785_v4, 0.0  ;;  %v788_v56 = vadd.f32 %v787_v53, %v2547_v25  ;;  %v789_v18 = vpop.f32.mrb[55].mxu1  ;;  %v1516_v30 = vadd.f32 %v1515_v49, %v2678_v9  ;;  %v1191_v1 = vsel %vm3127_vm15, %v932_v34, 0.0  ;;  %vm1820_vm12 = vmpackc.low %vm3131_vm6, %vm3129_vm8  ;;  %v3135_v4 = vld [vmem:[#allocation20_spill] sm:$0xff]  ;;  %v3140_v53 = vld [vmem:[#allocation13_spill] sm:$0xff] }
 0x16a   : > { %v1480_v7 = vadd.f32 %v1479_v41, %v1185_v52  ;;  %v3132_v26 = vpack.i.bf16 %v2643_v22, %v2629_v11  ;;  %v3136_v28 = vpack.i.bf16 %v3135_v4, %v2647_v12  ;;  %v2115_v11 = vmov 1966171168   ;;  %v3138_v41 = vld [vmem:[#allocation12_spill] sm:$0xff]  ;;  %v3142_v18 = vld [vmem:[#allocation21_spill] sm:$0xff] }
 0x16b   : > { %v898_v55 = vmax.f32 %v788_v56, 0.0  ;;  %1912 = vxpose.xlu0.b32.cont [10/16] %v3124_v29, 128  ;;  %v1517_v62 = vadd.f32 %v1516_v30, %v2684_v43  ;;  %v1530_v22 = vunpack.c.l.s4 %v2115_v11  ;;  %vm3137_vm10 = vcmp.lt.s32.totalorder %v2790_v24, 640 }
 0x16c   : > { %v1481_v59 = vadd.f32 %v1480_v7, %v1188_v10  ;;  %vm3139_vm11 = vcmp.lt.s32.totalorder %v3138_v41, 640  ;;  %v3143_v24 = vpack.i.bf16 %v3142_v18, %v2678_v9  ;;  %v3144_v10 = vld [vmem:[#allocation22_spill] sm:$0xff]  ;;  %v3146_v44 = vpack.i.bf16 %v3145_v60, %v2684_v43 }
 0x16d   : > { %v1816_v16 = vpack.c.bf16 %v898_v55, %v895_v19  ;;  %v1518_v15 = vadd.f32 %v1517_v62, %v2717_v48  ;;  %v1531_v30 = vunpack.c.0.s8 %v1530_v22  ;;  %vm3155_vm6 = vcmp.lt.s32.totalorder %v2480_v32, 640 }
 0x16e   : > { %v792_v5 = vpop.f32.mrb[56].mxu1  ;;  %v1482_v42 = vadd.f32 %v1481_v59, %v1191_v1 }
 0x16f   : > { %v793_v13 = vadd.f32 %v792_v5, %v2547_v25  ;;  %v794_v20 = vpop.f32.mrb[57].mxu1  ;;  %1818 = vmatprep.subr.msk.bf16.mxu0 %vm1817_vm5, %v1816_v16  ;;  %1914 = vxpose.xlu0.b32.cont [11/16] %v3132_v26, 128  ;;  %v1519_v17 = vadd.f32 %v1518_v15, %v3133_v3  ;;  %vm3141_vm5 = vcmp.lt.s32.totalorder %v3140_v53, 640  ;;  %v1534_v9 = vsub.s32 %v1531_v30, %v2303_v36 }
 0x170   : > { %v795_v58 = vpop.f32.mrb[58].mxu1  ;;  %1821 = vmatpush3.bf16.msk.msra.mxu0 %vm1820_vm12, %v3134_v47  ;;  %v1483_v45 = vrot.slane %v1482_v42, 4  ;;  %vm1823_vm12 = vmpackc.low %vm1023_vm13, %vm3137_vm10  ;;  %vm3147_vm13 = vcmp.lt.s32.totalorder %v2823_v40, 640  ;;  %vm3156_vm10 = vcmp.lt.s32.totalorder %v2483_v38, 640 }
 0x171   : > { %v901_v2 = vmax.f32 %v793_v13, 0.0  ;;  %v796_v8 = vadd.f32 %v795_v58, %v2547_v25  ;;  %v797_v54 = vpop.f32.mrb[59].mxu1  ;;  %v1520_v50 = vrot.slane %v1519_v17, 4  ;;  %vm1826_vm15 = vmpackc.low %vm3141_vm5, %vm3139_vm11 }
 0x172   : > { %v1484_v21 = vadd.f32 %v1483_v45, %v1482_v42  ;;  %vm1829_vm8 = vmpackc.low %vm3147_vm13, %vm1024_vm1  ;;  %v3150_v45 = vld [vmem:[#allocation26_spill] sm:$0xff] }
 0x173   : > { %v904_v31 = vmax.f32 %v796_v8, 0.0  ;;  %1916 = vxpose.xlu0.b32.cont [12/16] %v3136_v28, 128  ;;  %v1521_v46 = vadd.f32 %v1520_v50, %v1519_v17  ;;  %v3148_v17 = vld [vmem:[#allocation24_spill] sm:$0xff]  ;;  %v3152_v50 = vlaneseq }
 0x174   : > { %v1485_v49 = vrot.slane %v1484_v21, 2  ;;  %v3149_v58 = vpack.i.bf16 %v3148_v17, %v2717_v48 }
 0x175   : > { %v1822_v52 = vpack.c.bf16 %v904_v31, %v901_v2  ;;  %v1522_v35 = vrot.slane %v1521_v46, 2  ;;  %vm1547_vm1 = vcmp.lt.s32.totalorder %v3152_v50, 256  ;;  %v3153_v31 = vld [vmem:[#allocation27_spill] sm:$0xff] }
 0x176   : > { %v800_v34 = vpop.f32.mrb[60].mxu1  ;;  %v1486_v19 = vadd.f32 %v1485_v49, %v1484_v21  ;;  %v3154_v4 = vpack.i.bf16 %v3153_v31, %v3133_v3 }
 0x177   : > { %v801_v12 = vadd.f32 %v800_v34, %v2547_v25  ;;  %v802_v56 = vpop.f32.mrb[61].mxu1  ;;  %1824 = vmatprep.subr.msk.bf16.mxu0 %vm1823_vm12, %v1822_v52  ;;  %1918 = vxpose.xlu0.b32.cont [13/16] %v3143_v24, 128  ;;  %v1523_v14 = vadd.f32 %v1522_v35, %v1521_v46  ;;  %vm1835_vm12 = vmpackc.low %vm3156_vm10, %vm3155_vm6  ;;  %v3157_v52 = vld [vmem:[#allocation28_spill] sm:$0xff] }
 0x178   : > { %v803_v7 = vpop.f32.mrb[62].mxu1  ;;  %1827 = vmatpush3.bf16.msk.msra.mxu0 %vm1826_vm15, %v3144_v10  ;;  %v1487_v55 = vrot.slane %v1486_v19, 1 }
 0x179   : > { %v907_v61 = vmax.f32 %v801_v12, 0.0  ;;  %v804_v29 = vadd.f32 %v803_v7, %v2547_v25  ;;  %v805_v62 = vpop.f32.mrb[63].mxu1  ;;  %v1524_v59 = vrot.slane %v1523_v14, 1 }
 0x17a   : > { %v1488_v1 = vadd.f32 %v1487_v55, %v1486_v19 }
 0x17b   : > { %v910_v16 = vmax.f32 %v804_v29, 0.0  ;;  %1920 = vxpose.xlu0.b32.cont [14/16] %v3146_v44, 128  ;;  %v1525_v15 = vadd.f32 %v1524_v59, %v1523_v14 }
 0x17d   : > { %v1828_v5 = vpack.c.bf16 %v910_v16, %v907_v61  ;;  %v1528_v42 = vcombine.low %v1488_v1, %v1525_v15 }
 0x17e   : > { %v808_v13 = vpop.f32.mrb[64].mxu1 }
 0x17f   : > { %v809_v20 = vadd.f32 %v808_v13, %v2547_v25  ;;  %v810_v26 = vpop.f32.mrb[65].mxu1  ;;  %1830 = vmatprep.subr.msk.bf16.mxu0 %vm1829_vm8, %v1828_v5  ;;  %1922 = vxpose.xlu0.b32.cont [15/16] %v3149_v58, 128  ;;  %v1535_v43 = vrot.slane %v1528_v42, %v1534_v9 }
 0x180   : > { %v811_v47 = vpop.f32.mrb[66].mxu1  ;;  %1833 = vmatpush3.bf16.msk.msra.mxu0 %vm2350_vm4, %v3150_v45  ;;  %vm3159_vm4 = vcmp.lt.s32.totalorder %v2522_v27, 640 }
 0x181   : > { %v913_v40 = vmax.f32 %v809_v20, 0.0  ;;  %v812_v2 = vadd.f32 %v811_v47, %v2547_v25  ;;  %v813_v8 = vpop.f32.mrb[67].mxu1  ;;  %v1542_v54 = vrot.slane %v1535_v43, %v1534_v9  ;;  %vm1841_vm11 = vmpackc.low %vm1029_vm3, %vm3159_vm4 }
 0x183   : > { %v916_v21 = vmax.f32 %v812_v2, 0.0  ;;  %1924 = vxpose.xlu0.b32.end [16/16] %v3154_v4, 128  ;;  %v1544_v48 = vadd.f32 %v1542_v54, %v1451_v0 }
 0x185   : > { %v1834_v28 = vpack.c.bf16 %v916_v21, %v913_v40  ;;  %1549 = vst.msk [vmem:[#allocation4] sm:$0x3] %vm1547_vm1, %v1544_v48 }
 0x186   : > { %v816_v46 = vpop.f32.mrb[68].mxu1 }
 0x187   : > { %v817_v11 = vadd.f32 %v816_v46, %v2547_v25  ;;  %v818_v22 = vpop.f32.mrb[69].mxu1  ;;  %1836 = vmatprep.subr.msk.bf16.mxu0 %vm1835_vm12, %v1834_v28 }
 0x188   : > { %v819_v49 = vpop.f32.mrb[70].mxu1  ;;  %1839 = vmatpush3.bf16.msk.msra.mxu0 %vm2405_vm9, %v3157_v52  ;;  %vm3161_vm9 = vcmp.lt.s32.totalorder %v2611_v33, 640 }
 0x189   : > { %v919_v3 = vmax.f32 %v817_v11, 0.0  ;;  %v820_v53 = vadd.f32 %v819_v49, %v2547_v25  ;;  %v821_v35 = vpop.f32.mrb[71].mxu1  ;;  %vm1847_vm3 = vmpackc.low %vm3161_vm9, %vm1030_vm7  ;;  %vm3164_vm7 = vcmp.lt.s32.totalorder %v2668_v37, 640 }
 0x18b   : > { %v922_v32 = vmax.f32 %v820_v53, 0.0 }
 0x18d   : > { %v1840_v38 = vpack.c.bf16 %v922_v32, %v919_v3 }
 0x18e   : > { %v824_v34 = vpop.f32.mrb[72].mxu1 }
 0x18f   : > { %v825_v19 = vadd.f32 %v824_v34, %v2547_v25  ;;  %v826_v12 = vpop.f32.mrb[73].mxu1  ;;  %1842 = vmatprep.subr.msk.bf16.mxu0 %vm1841_vm11, %v1840_v38 }
 0x190   : > { %v827_v56 = vpop.f32.mrb[74].mxu1  ;;  %1845 = vmatpush3.bf16.msk.msra.mxu0 %vm2460_vm14, %v2796_v23  ;;  %vm3163_vm14 = vcmp.lt.s32.totalorder %v2624_v6, 640 }
 0x191   : > { %v925_v24 = vmax.f32 %v825_v19, 0.0  ;;  %v828_v14 = vadd.f32 %v827_v56, %v2547_v25  ;;  %v829_v30 = vpop.f32.mrb[75].mxu1  ;;  %vm1853_vm5 = vmpackc.low %vm3164_vm7, %vm3163_vm14 }
 0x193   : > { %v928_v7 = vmax.f32 %v828_v14, 0.0 }
 0x195   : > { %v1846_v27 = vpack.c.bf16 %v928_v7, %v925_v24 }
 0x196   : > { %v832_v39 = vpop.f32.mrb[76].mxu1 }
 0x197   : > { %v833_v10 = vadd.f32 %v832_v39, %v2547_v25  ;;  %v834_v55 = vpop.f32.mrb[77].mxu1  ;;  %1848 = vmatprep.subr.msk.bf16.mxu0 %vm1847_vm3, %v1846_v27 }
 0x198   : > { %v835_v61 = vpop.f32.mrb[78].mxu1  ;;  %1851 = vmatpush3.bf16.msk.msra.mxu0 %vm2515_vm0, %v2827_v63 }
 0x199   : > { %v931_v23 = vmax.f32 %v833_v10, 0.0  ;;  %v836_v62 = vadd.f32 %v835_v61, %v2547_v25  ;;  %v837_v59 = vpop.f32.mrb[79].mxu1 }
 0x19b   : > { %v934_v1 = vmax.f32 %v836_v62, 0.0 }
 0x19d   : > { %v1852_v57 = vpack.c.bf16 %v934_v1, %v931_v23 }
 0x19f   : > { %1854 = vmatprep.subr.msk.bf16.mxu0 %vm1853_vm5, %v1852_v57 }
 0x1a0   : > { %1857 = vmatpush3.bf16.msk.msra.mxu0 %vm2573_vm2, %v2855_v51 }
 0x1c7   : > { %v1925_v16 = vpop.trf.xlu0 }
 0x1c8   : > { %v1929_v60 = vunpack.i.h.bf16 %v1925_v16  ;;  %v1926_v44 = vunpack.i.l.bf16 %v1925_v16 }
 0x1ca   : > { %1338 = vmatprep.mubr.f32.mxu0 %v1926_v44 }
 0x1cb   : > { %v1930_v63 = vpop.trf.xlu0  ;;  %1339 = vmatmul.mubr.f32.vlgmr.msra.gmra.mrb[48].mxu0 %v1929_v60 }
 0x1cc   : > { %v1931_v25 = vunpack.i.l.bf16 %v1930_v63  ;;  %v1934_v15 = vunpack.i.h.bf16 %v1930_v63 }
 0x1ce   : > { %1343 = vmatprep.mubr.f32.mxu0 %v1931_v25 }
 0x1cf   : > { %v1935_v9 = vpop.trf.xlu0  ;;  %1344 = vmatmul.mubr.f32.gmra.mrb[50].mxu0 %v1934_v15 }
 0x1d0   : > { %v1936_v6 = vunpack.i.l.bf16 %v1935_v9  ;;  %v1939_v37 = vunpack.i.h.bf16 %v1935_v9 }
 0x1d2   : > { %1348 = vmatprep.mubr.f32.mxu0 %v1936_v6 }
 0x1d3   : > { %v1940_v5 = vpop.trf.xlu0  ;;  %1349 = vmatmul.mubr.f32.gmra.mrb[52].mxu0 %v1939_v37 }
 0x1d4   : > { %v1941_v42 = vunpack.i.l.bf16 %v1940_v5  ;;  %v1944_v13 = vunpack.i.h.bf16 %v1940_v5 }
 0x1d6   : > { %1353 = vmatprep.mubr.f32.mxu0 %v1941_v42 }
 0x1d7   : > { %v1945_v51 = vpop.trf.xlu0  ;;  %1354 = vmatmul.mubr.f32.gmra.mrb[54].mxu0 %v1944_v13 }
 0x1d8   : > { %v1946_v20 = vunpack.i.l.bf16 %v1945_v51  ;;  %v1949_v26 = vunpack.i.h.bf16 %v1945_v51 }
 0x1da   : > { %1358 = vmatprep.mubr.f32.mxu0 %v1946_v20 }
 0x1db   : > { %v1950_v17 = vpop.trf.xlu0  ;;  %1359 = vmatmul.mubr.f32.gmra.mrb[56].mxu0 %v1949_v26 }
 0x1dc   : > { %v1951_v58 = vunpack.i.l.bf16 %v1950_v17  ;;  %v1954_v43 = vunpack.i.h.bf16 %v1950_v17 }
 0x1de   : > { %1363 = vmatprep.mubr.f32.mxu0 %v1951_v58 }
 0x1df   : > { %v1955_v47 = vpop.trf.xlu0  ;;  %1364 = vmatmul.mubr.f32.gmra.mrb[58].mxu0 %v1954_v43 }
 0x1e0   : > { %v1956_v45 = vunpack.i.l.bf16 %v1955_v47  ;;  %v1959_v36 = vunpack.i.h.bf16 %v1955_v47 }
 0x1e2   : > { %1368 = vmatprep.mubr.f32.mxu0 %v1956_v45 }
 0x1e3   : > { %v1960_v0 = vpop.trf.xlu0  ;;  %1369 = vmatmul.mubr.f32.gmra.mrb[60].mxu0 %v1959_v36 }
 0x1e4   : > { %v1961_v40 = vunpack.i.l.bf16 %v1960_v0  ;;  %v1964_v2 = vunpack.i.h.bf16 %v1960_v0 }
 0x1e6   : > { %1373 = vmatprep.mubr.f32.mxu0 %v1961_v40 }
 0x1e7   : > { %v1965_v8 = vpop.trf.xlu0  ;;  %1374 = vmatmul.mubr.f32.gmra.mrb[62].mxu0 %v1964_v2 }
 0x1e8   : > { %v1966_v54 = vunpack.i.l.bf16 %v1965_v8  ;;  %v1969_v50 = vunpack.i.h.bf16 %v1965_v8 }
 0x1ea   : > { %1378 = vmatprep.mubr.f32.mxu0 %v1966_v54 }
 0x1eb   : > { %v1970_v21 = vpop.trf.xlu0  ;;  %1379 = vmatmul.mubr.f32.gmra.mrb[64].mxu0 %v1969_v50 }
 0x1ec   : > { %v1971_v31 = vunpack.i.l.bf16 %v1970_v21  ;;  %v1974_v4 = vunpack.i.h.bf16 %v1970_v21 }
 0x1ee   : > { %1383 = vmatprep.mubr.f32.mxu0 %v1971_v31 }
 0x1ef   : > { %v1975_v48 = vpop.trf.xlu0  ;;  %1384 = vmatmul.mubr.f32.gmra.mrb[66].mxu0 %v1974_v4 }
 0x1f0   : > { %v1976_v28 = vunpack.i.l.bf16 %v1975_v48  ;;  %v1979_v46 = vunpack.i.h.bf16 %v1975_v48 }
 0x1f2   : > { %1388 = vmatprep.mubr.f32.mxu0 %v1976_v28 }
 0x1f3   : > { %v1980_v11 = vpop.trf.xlu0  ;;  %1389 = vmatmul.mubr.f32.gmra.mrb[68].mxu0 %v1979_v46 }
 0x1f4   : > { %v1981_v22 = vunpack.i.l.bf16 %v1980_v11  ;;  %v1984_v49 = vunpack.i.h.bf16 %v1980_v11 }
 0x1f6   : > { %1393 = vmatprep.mubr.f32.mxu0 %v1981_v22 }
 0x1f7   : > { %v1985_v52 = vpop.trf.xlu0  ;;  %1394 = vmatmul.mubr.f32.gmra.mrb[70].mxu0 %v1984_v49 }
 0x1f8   : > { %v1986_v41 = vunpack.i.l.bf16 %v1985_v52  ;;  %v1989_v3 = vunpack.i.h.bf16 %v1985_v52 }
 0x1fa   : > { %1398 = vmatprep.mubr.f32.mxu0 %v1986_v41 }
 0x1fb   : > { %v1990_v53 = vpop.trf.xlu0  ;;  %1399 = vmatmul.mubr.f32.gmra.mrb[72].mxu0 %v1989_v3 }
 0x1fc   : > { %v1991_v35 = vunpack.i.l.bf16 %v1990_v53  ;;  %v1994_v32 = vunpack.i.h.bf16 %v1990_v53 }
 0x1fe   : > { %1403 = vmatprep.mubr.f32.mxu0 %v1991_v35 }
 0x1ff   : > { %v1995_v38 = vpop.trf.xlu0  ;;  %1404 = vmatmul.mubr.f32.gmra.mrb[74].mxu0 %v1994_v32 }
 0x200   : > { %v1996_v34 = vunpack.i.l.bf16 %v1995_v38  ;;  %v1999_v19 = vunpack.i.h.bf16 %v1995_v38 }
 0x202   : > { %1408 = vmatprep.mubr.f32.mxu0 %v1996_v34 }
 0x203   : > { %v2000_v12 = vpop.trf.xlu0  ;;  %1409 = vmatmul.mubr.f32.gmra.mrb[76].mxu0 %v1999_v19 }
 0x204   : > { %v2004_v56 = vunpack.i.h.bf16 %v2000_v12  ;;  %v2001_v18 = vunpack.i.l.bf16 %v2000_v12 }
 0x206   : > { %1413 = vmatprep.mubr.f32.mxu0 %v2001_v18 }
 0x207   : > { %1414 = vmatmul.mubr.f32.gmra.mrb[78].mxu0 %v2004_v56 }
 0x208   : > { %2058 = shalt.err (!%p2055_p12)
}
 0x209   : > { %s2059_s12 = scalar_lea.hbm %s3049_s4, 32 }
 0x20a   : > { %p2060_p13 = scmp.ne.s32.totalorder %s3049_s4, %s2059_s12  ;;  %p2065_p2 = scmp.lt.u32.totalorder %s2059_s12, %s3049_s4 }
 0x20c   : > { %p2061_p0 = pnand %p2060_p13, %p1874_p5 }
 0x20e   : > { %p2062_p1 = pneg %p2061_p0 }
 0x210   : > { %p2067_p3 = pnand %p2065_p2, %p2062_p1 }
 0x212   : > { %2070 = shalt.err (!%p2067_p3)
}
 0x213   : > { %1869 = dma.vmem_to_hbm [thread:$0]  (%p1874_p5), %s1571_s8, 32, %s3049_s4, [#allocation5]   ;;  %v1194_v14 = vld [vmem:[#allocation2] sm:$0xff]  ;;  %v1195_v10 = vld [vmem:[#allocation2 + $0x8] sm:$0xff]  ;;  %v1196_v62 = vld [vmem:[#allocation2 + $0x10] sm:$0xff] }
 0x214   : > { %v1197_v16 = vld [vmem:[#allocation2 + $0x18] sm:$0xff]  ;;  %v1198_v15 = vld [vmem:[#allocation2 + $0x20] sm:$0xff]  ;;  %v1199_v42 = vld [vmem:[#allocation2 + $0x28] sm:$0xff]  ;;  %s2117_s22 = smov [#allocation2]  }
 0x215   : > { %v1200_v17 = vld [vmem:[#allocation2 + $0x30] sm:$0xff]  ;;  %v1201_v36 = vld [vmem:[#allocation2 + $0x38] sm:$0xff]  ;;  %v1202_v54 = vld [vmem:[#allocation2 + $0x40] sm:$0xff]  ;;  %s1556_s23 = sshll.u32 %s2117_s22, 4  ;;  %s1557_s23 = int_to_ptr.vmem [resolvable:$true] %s1556_s23 }
 0x216   : > { %v1203_v48 = vld [vmem:[#allocation2 + $0x48] sm:$0xff]  ;;  %v1204_v49 = vld [vmem:[#allocation2 + $0x50] sm:$0xff]  ;;  %v1205_v35 = vld [vmem:[#allocation2 + $0x58] sm:$0xff]  ;;  %s2071_s24 = scalar_lea.vmem %s1557_s23, 2048  ;;  %p2078_p8 = scmp.lt.s32.totalorder %s1557_s23, %s1557_s23 }
 0x217   : > { %v1206_v12 = vld [vmem:[#allocation2 + $0x60] sm:$0xff]  ;;  %p2072_p4 = scmp.ne.s32.totalorder %s1557_s23, %s2071_s24  ;;  %p2079_p9 = scmp.lt.s32.totalorder %s2071_s24, %s2071_s24 }
 0x219   : > { %p2073_p6 = pnand %p2072_p4, %p1874_p5  ;;  %p2080_p10 = por %p2079_p9, %p2078_p8 }
 0x21b   : > { %p2074_p7 = pneg %p2073_p6 }
 0x21d   : > { %p2081_p11 = pnand %p2080_p10, %p2074_p7 }
 0x29e   : > { %v1762_v24 = vpop.f32.mrb[48].mxu0 }
 0x29f   : > { %v1763_v30 = vpop.f32.mrb[49].mxu0 }
 0x2a0   : > { %v1764_v7 = vadd.f32 %v1763_v30, %v1762_v24  ;;  %v1207_v30 = vld [vmem:[#allocation2 + $0x68] sm:$0xff] }
 0x2a2   : > { %v1419_v27 = vadd.f32 %v1764_v7, %v1194_v14  ;;  %v1765_v39 = vpop.f32.mrb[50].mxu0 }
 0x2a3   : > { %v1766_v55 = vpop.f32.mrb[51].mxu0 }
 0x2a4   : > { %1435 = vst [vmem:[#allocation2] sm:$0xff] %v1419_v27  ;;  %v1767_v61 = vadd.f32 %v1766_v55, %v1765_v39  ;;  %v1208_v55 = vld [vmem:[#allocation2 + $0x70] sm:$0xff] }
 0x2a6   : > { %v1420_v29 = vadd.f32 %v1767_v61, %v1195_v10  ;;  %v1768_v23 = vpop.f32.mrb[52].mxu0 }
 0x2a7   : > { %v1769_v59 = vpop.f32.mrb[53].mxu0 }
 0x2a8   : > { %1436 = vst [vmem:[#allocation2 + $0x8] sm:$0xff] %v1420_v29  ;;  %v1770_v1 = vadd.f32 %v1769_v59, %v1768_v23  ;;  %v1209_v59 = vld [vmem:[#allocation2 + $0x78] sm:$0xff] }
 0x2aa   : > { %v1421_v57 = vadd.f32 %v1770_v1, %v1196_v62  ;;  %v1771_v33 = vpop.f32.mrb[54].mxu0 }
 0x2ab   : > { %v1772_v60 = vpop.f32.mrb[55].mxu0 }
 0x2ac   : > { %1437 = vst [vmem:[#allocation2 + $0x10] sm:$0xff] %v1421_v57  ;;  %v1773_v44 = vadd.f32 %v1772_v60, %v1771_v33 }
 0x2ae   : > { %v1422_v63 = vadd.f32 %v1773_v44, %v1197_v16  ;;  %v1774_v25 = vpop.f32.mrb[56].mxu0 }
 0x2af   : > { %v1775_v9 = vpop.f32.mrb[57].mxu0 }
 0x2b0   : > { %1438 = vst [vmem:[#allocation2 + $0x18] sm:$0xff] %v1422_v63  ;;  %v1776_v6 = vadd.f32 %v1775_v9, %v1774_v25 }
 0x2b2   : > { %v1423_v37 = vadd.f32 %v1776_v6, %v1198_v15  ;;  %v1777_v5 = vpop.f32.mrb[58].mxu0 }
 0x2b3   : > { %v1778_v13 = vpop.f32.mrb[59].mxu0 }
 0x2b4   : > { %1439 = vst [vmem:[#allocation2 + $0x20] sm:$0xff] %v1423_v37  ;;  %v1779_v51 = vadd.f32 %v1778_v13, %v1777_v5 }
 0x2b6   : > { %v1424_v20 = vadd.f32 %v1779_v51, %v1199_v42  ;;  %v1780_v26 = vpop.f32.mrb[60].mxu0 }
 0x2b7   : > { %v1781_v58 = vpop.f32.mrb[61].mxu0 }
 0x2b8   : > { %1440 = vst [vmem:[#allocation2 + $0x28] sm:$0xff] %v1424_v20  ;;  %v1782_v43 = vadd.f32 %v1781_v58, %v1780_v26 }
 0x2ba   : > { %v1425_v47 = vadd.f32 %v1782_v43, %v1200_v17  ;;  %v1783_v45 = vpop.f32.mrb[62].mxu0 }
 0x2bb   : > { %v1784_v0 = vpop.f32.mrb[63].mxu0 }
 0x2bc   : > { %1441 = vst [vmem:[#allocation2 + $0x30] sm:$0xff] %v1425_v47  ;;  %v1785_v40 = vadd.f32 %v1784_v0, %v1783_v45 }
 0x2be   : > { %v1426_v2 = vadd.f32 %v1785_v40, %v1201_v36  ;;  %v1786_v8 = vpop.f32.mrb[64].mxu0 }
 0x2bf   : > { %v1787_v50 = vpop.f32.mrb[65].mxu0 }
 0x2c0   : > { %1442 = vst [vmem:[#allocation2 + $0x38] sm:$0xff] %v1426_v2  ;;  %v1788_v21 = vadd.f32 %v1787_v50, %v1786_v8 }
 0x2c2   : > { %v1427_v31 = vadd.f32 %v1788_v21, %v1202_v54  ;;  %v1789_v4 = vpop.f32.mrb[66].mxu0 }
 0x2c3   : > { %v1790_v28 = vpop.f32.mrb[67].mxu0 }
 0x2c4   : > { %1443 = vst [vmem:[#allocation2 + $0x40] sm:$0xff] %v1427_v31  ;;  %v1791_v46 = vadd.f32 %v1790_v28, %v1789_v4 }
 0x2c6   : > { %v1428_v11 = vadd.f32 %v1791_v46, %v1203_v48  ;;  %v1792_v22 = vpop.f32.mrb[68].mxu0 }
 0x2c7   : > { %v1793_v52 = vpop.f32.mrb[69].mxu0 }
 0x2c8   : > { %1444 = vst [vmem:[#allocation2 + $0x48] sm:$0xff] %v1428_v11  ;;  %v1794_v41 = vadd.f32 %v1793_v52, %v1792_v22 }
 0x2ca   : > { %v1429_v3 = vadd.f32 %v1794_v41, %v1204_v49  ;;  %v1795_v53 = vpop.f32.mrb[70].mxu0 }
 0x2cb   : > { %v1796_v32 = vpop.f32.mrb[71].mxu0 }
 0x2cc   : > { %1445 = vst [vmem:[#allocation2 + $0x50] sm:$0xff] %v1429_v3  ;;  %v1797_v38 = vadd.f32 %v1796_v32, %v1795_v53 }
 0x2ce   : > { %v1430_v34 = vadd.f32 %v1797_v38, %v1205_v35  ;;  %v1798_v19 = vpop.f32.mrb[72].mxu0 }
 0x2cf   : > { %v1799_v56 = vpop.f32.mrb[73].mxu0 }
 0x2d0   : > { %1446 = vst [vmem:[#allocation2 + $0x58] sm:$0xff] %v1430_v34  ;;  %v1800_v18 = vadd.f32 %v1799_v56, %v1798_v19 }
 0x2d2   : > { %v1431_v24 = vadd.f32 %v1800_v18, %v1206_v12  ;;  %v1801_v14 = vpop.f32.mrb[74].mxu0 }
 0x2d3   : > { %v1802_v7 = vpop.f32.mrb[75].mxu0 }
 0x2d4   : > { %1447 = vst [vmem:[#allocation2 + $0x60] sm:$0xff] %v1431_v24  ;;  %v1803_v27 = vadd.f32 %v1802_v7, %v1801_v14 }
 0x2d6   : > { %v1432_v39 = vadd.f32 %v1803_v27, %v1207_v30  ;;  %v1804_v10 = vpop.f32.mrb[76].mxu0 }
 0x2d7   : > { %v1805_v61 = vpop.f32.mrb[77].mxu0 }
 0x2d8   : > { %1448 = vst [vmem:[#allocation2 + $0x68] sm:$0xff] %v1432_v39  ;;  %v1806_v29 = vadd.f32 %v1805_v61, %v1804_v10 }
 0x2da   : > { %v1433_v23 = vadd.f32 %v1806_v29, %v1208_v55  ;;  %v1807_v62 = vpop.f32.mrb[78].mxu0 }
 0x2db   : > { %v1808_v1 = vpop.f32.mrb[79].mxu0 }
 0x2dc   : > { %1449 = vst [vmem:[#allocation2 + $0x70] sm:$0xff] %v1433_v23  ;;  %v1809_v57 = vadd.f32 %v1808_v1, %v1807_v62 }
 0x2de   : > { %v1434_v33 = vadd.f32 %v1809_v57, %v1209_v59 }
 0x2e0   : > { %1450 = vst [vmem:[#allocation2 + $0x78] sm:$0xff] %v1434_v33 }
 0x2e1   : > { %2084 = shalt.err (!%p2081_p11)
}
 0x2e2   : > { %s2085_s27 = scalar_lea.hbm %s3048_s3, 2048 }
 0x2e3   : > { %p2086_p12 = scmp.ne.s32.totalorder %s3048_s3, %s2085_s27  ;;  %p2091_p1 = scmp.lt.u32.totalorder %s2085_s27, %s3048_s3 }
 0x2e5   : > { %p2087_p13 = pnand %p2086_p12, %p1874_p5 }
 0x2e7   : > { %p2088_p0 = pneg %p2087_p13 }
 0x2e9   : > { %p2093_p2 = pnand %p2091_p1, %p2088_p0 }
 0x2eb   : > { %2096 = shalt.err (!%p2093_p2)
}
 0x2ec   : > { %s2118_s5 = smov 128   ;;  %s2119_s6 = smov 8  }
 0x2ed   : > { %1867 = dma.vmem_to_hbm [thread:$0]  (%p1874_p5), %s1557_s23, 2048, %s3048_s3, [#allocation3], %s2118_s5, %s2118_s5, %s2119_s6  }
 0x2ee   : > { %2102 = dma.done.wait (%p1874_p5), [#allocation3], 2048  }
 0x2ef   : > { %2104 = vsyncadd (%p1874_p5), [#allocation3], 4294965248 }
 0x2f0   : > { %2106 = dma.done.wait (%p1874_p5), [#allocation5], 32  }
 0x2f1   : > { %2108 = vsyncadd (%p1874_p5), [#allocation5], 4294967264 }
 0x2f2 PF: > { %s17_s15 = sadd.s32 1, %s2111_s15  }
 0x2f3   : > { %p14_p3 = scmp.ge.s32.totalorder %s17_s15, 5  }
 0x2f5   :  { %16 = sbr.rel (!%p14_p3) target bundleno = 2 (0x2), region = 71 }
 0x2fc   :  { %1587 = vsyncpa [#allocation3], 1 }
 0x2fd   :  { %1589 = vsyncpa [#allocation3 + $0x1], 1 }
 0x2fe   :  { %1590 = vsyncpa [#allocation5], 1 }

</bundles_post_ra>
